<compile_context>
chip_gen: v6e
topology: v6e:2x2x1
jax: 0.10.0
libtpu: 0.0.40
codegen_flags: <defaults>
</compile_context>

<pallas_src>
import functools

import jax
import jax.numpy as jnp
from jax.experimental import pallas as pl
from jax.experimental.pallas import tpu as pltpu

F32 = jnp.float32
BF16 = jnp.bfloat16

# ---- fixed structure of the torch module -----------------------------------
N_ATTR = 14
TARGET_L = 5
TEMP_HID = 64                         # NeuralPointProcess hidden width
CONT_SLOTS = (1, 2, 3, 7, 8)          # width, length, draught, sog, rot
DISC_SLOTS = (0, 4, 5, 6)             # vessel_type, destination, cargo, navi
DISC_NAMES = ('vessel_type', 'destination', 'cargo_type', 'navi_status')

# Column layout of the fused first-stage activation H = x_flat @ W_merged + b_merged
HC_CONT = 0                           # 5 cols : continuous heads (stats folded in)
HC_COG = 5                            # 2 cols : COG cyclical
HC_HEAD = 7                           # 2 cols : heading cyclical
HC_SPAT = 9                           # 2 cols : spatio (lambda, phi)
HC_TEMP = 11                          # 64 cols: temporal hidden
HC_DISC = 128                         # 4*D cols: discrete z (lane-tile aligned)


def _out_layout(emb_dim, c_max):
    """Column layout of the packed lane-dense output slab."""
    zoff = 14                         # cont5 + cog2 + head2 + spatio2 + delta2 + tau1
    yoff = zoff + 4 * emb_dim
    nc = yoff + 4 * c_max
    nc_pad = ((nc + 127) // 128) * 128
    return zoff, yoff, nc, nc_pad


# --------------------------------------------------------------------------
# wrapper glue (plain JAX): input layout prep + torch.no_grad sliding window
# --------------------------------------------------------------------------
def build_fusion_input(input_list, target_l=TARGET_L):
    """align_and_concatenate_tensors + GatedFusionTwo's per-attribute flatten,
    emitted directly as [bs, 14*5f] (attribute-major along K)."""
    parts = []
    for t in input_list:
        bs_, n_i, l_i, fdim = t.shape
        if l_i < target_l:
            t = jnp.pad(t, ((0, 0), (0, 0), (0, target_l - l_i), (0, 0)))
        else:
            t = t[:, :, :target_l, :]
        parts.append(t.reshape(bs_, n_i, target_l * fdim))
    x = jnp.concatenate(parts, axis=1)                # [bs, 14, 5f]
    return x.reshape(x.shape[0], -1)                  # [bs, 14*5f]


def sliding_window_base(values, missing_value, window_size=5):
    """SpatioDecoder.calculate_sliding_window_base (plain JAX glue)."""
    mask = (values != missing_value).astype(F32)
    masked = values * mask
    pad = window_size
    pv = jnp.pad(masked, ((0, 0), (pad, pad)))
    pm = jnp.pad(mask, ((0, 0), (pad, pad)))
    s = values.shape[1]
    win_sum = jnp.zeros_like(values)
    win_cnt = jnp.zeros_like(values)
    for i in range(2 * window_size + 1):
        win_sum = win_sum + pv[:, i:i + s]
        win_cnt = win_cnt + pm[:, i:i + s]
    win_cnt = jnp.maximum(win_cnt, 1.0)
    return jnp.deg2rad((win_sum / win_cnt).reshape(-1))   # [b*s]


# --------------------------------------------------------------------------
# the single fused Pallas kernel
# --------------------------------------------------------------------------
def _decoder_kernel(x_ref, w_ref, b_ref, tw2_ref, proto_ref, side_ref, out_ref, *,
                    emb_dim, c_list, c_max, gamma_lambda, gamma_phi, tb2,
                    base_rate, smoothing, max_delta, nc_pad):
    tm = out_ref.shape[0]

    # ---- ONE fused MXU matmul: GatedFusionTwo + every head's first Linear ----
    xb = x_ref[...].astype(BF16)
    h_all = jnp.dot(xb, w_ref[...], preferred_element_type=F32) + b_ref[...]

    # ---- continuous heads (mu/sigma/alpha/beta already folded into W/b) -----
    cont = h_all[:, HC_CONT:HC_CONT + 5]

    # ---- cyclical heads: tanh(Linear(f, 2)) ---------------------------------
    cog = jnp.tanh(h_all[:, HC_COG:HC_COG + 2])
    head = jnp.tanh(h_all[:, HC_HEAD:HC_HEAD + 2])

    # ---- spatio head: base + tanh(Linear(2f, 1)) * gamma (scalar gammas) ----
    d_lam = jnp.tanh(h_all[:, HC_SPAT:HC_SPAT + 1]) * gamma_lambda
    d_phi = jnp.tanh(h_all[:, HC_SPAT + 1:HC_SPAT + 2]) * gamma_phi
    delta = jnp.concatenate([d_lam, d_phi], axis=-1)
    spatio = side_ref[:, 0:2] + delta

    # ---- temporal head: SiLU -> VPU-mul + lane-reduce -> Softplus -> PP -----
    h1 = h_all[:, HC_TEMP:HC_TEMP + TEMP_HID]
    h1 = h1 * pl.reciprocal(1.0 + jnp.exp(-h1), approx=True)        # SiLU
    raw = jnp.sum(h1 * tw2_ref[...], axis=-1, keepdims=True) + tb2
    softplus = jnp.maximum(raw, 0.0) + jnp.log1p(jnp.exp(-jnp.abs(raw)))
    intensity = jnp.maximum(softplus + base_rate, 1e-7)
    u = side_ref[:, 2:3]
    tau = jnp.clip(-jnp.log(u) * pl.reciprocal(intensity, approx=True),
                   1e-7, max_delta)

    # ---- discrete heads: ONE block-diagonal prototype matmul (1/temp folded) -
    z_all = h_all[:, HC_DISC:HC_DISC + 4 * emb_dim]
    logits = jnp.dot(z_all, proto_ref[...], preferred_element_type=F32)
    col = jax.lax.broadcasted_iota(jnp.int32, (tm, c_max), 1)        # built once
    ys = []
    for h in range(4):                                               # static
        c_h = c_list[h]
        valid = col < c_h
        lg = jnp.where(valid, logits[:, h * c_max:(h + 1) * c_max], -1e30)
        m = jnp.max(lg, axis=-1, keepdims=True)
        e = jnp.where(valid, jnp.exp(lg - m), 0.0)
        sm = e * pl.reciprocal(jnp.sum(e, axis=-1, keepdims=True), approx=True)
        ys.append(jnp.where(valid,
                            (1.0 - smoothing) * sm + smoothing / c_h, 0.0))

    # ---- single lane-dense full-width store ----------------------------------
    nc = 14 + 4 * emb_dim + 4 * c_max
    pieces = [cont, cog, head, spatio, delta, tau, z_all] + ys
    if nc_pad > nc:
        pieces.append(jnp.zeros((tm, nc_pad - nc), F32))
    out_ref[...] = jnp.concatenate(pieces, axis=-1)


def _pick_tm(bs):
    # Prefer >=2 sublane-aligned token tiles (keeps both v7x TensorCores busy),
    # cap at 512 (v5e 16 MiB scoped-VMEM default); fall back to whole batch.
    for tm in (512, 256, 128, 64, 32, 16, 8):
        if tm < bs and bs % tm == 0:
            return tm
    return bs


def fused_decoder_call(x_flat, pp, side, cfg):
    bs, kx = x_flat.shape
    nh = pp['w'].shape[1]
    nc_pad = cfg['nc_pad']
    tm = _pick_tm(bs)
    grid = (bs // tm,)
    # bf16 activations only when the token tile is bf16 sublane-pair aligned
    x_in = x_flat.astype(BF16) if (tm % 16 == 0 or tm == bs) else x_flat.astype(F32)

    kernel = functools.partial(
        _decoder_kernel,
        emb_dim=cfg['emb_dim'], c_list=cfg['c_list'], c_max=cfg['c_max'],
        gamma_lambda=cfg['gammas'][0], gamma_phi=cfg['gammas'][1],
        tb2=cfg['tb2'], base_rate=cfg['base_rate'],
        smoothing=cfg['smoothing'], max_delta=cfg['max_delta'], nc_pad=nc_pad)

    return pl.pallas_call(
        kernel,
        out_shape=jax.ShapeDtypeStruct((bs, nc_pad), F32),
        grid=grid,
        in_specs=[
            pl.BlockSpec((tm, kx), lambda t: (t, 0)),            # x_flat (token-tiled)
            pl.BlockSpec((kx, nh), lambda t: (0, 0)),            # merged weights (bf16)
            pl.BlockSpec((1, nh), lambda t: (0, 0)),             # merged bias
            pl.BlockSpec((1, TEMP_HID), lambda t: (0, 0)),       # intensity-net W2 row
            pl.BlockSpec(pp['proto'].shape, lambda t: (0, 0)),   # block-diag prototypes
            pl.BlockSpec((tm, 8), lambda t: (t, 0)),             # packed [base | u | pad]
        ],
        out_specs=pl.BlockSpec((tm, nc_pad), lambda t: (t, 0)),
        compiler_params=pltpu.CompilerParams(
            dimension_semantics=("parallel",)),
    )(x_in, pp['w'], pp['b'], pp['tw2'], pp['proto'], side)


# --------------------------------------------------------------------------
# parameters (deterministic synthetic init, shapes per the torch module)
# --------------------------------------------------------------------------
def init_params(key, f, D, data_status, max_delta=300.0):
    keys = jax.random.split(key, 32)
    ki = iter(keys)

    def nrm(shape, scale):
        return jax.random.normal(next(ki), shape, F32) * scale

    c_list = tuple(len(data_status[n + '_unique']) + 1 for n in DISC_NAMES)
    p = {'d_model': f, 'emb_dim': D, 'c_list': c_list,
         'max_delta': float(max_delta), 'smoothing': 0.1}
    # GatedFusionTwo: 14 x Linear(5f -> f)  (stored transposed: [5f, f])
    p['fusion_w'] = nrm((N_ATTR, TARGET_L * f, f), 1.0 / (TARGET_L * f) ** 0.5)
    p['fusion_b'] = nrm((N_ATTR, 1, f), 0.01)
    # 5 x ContinuousDecoder: Linear(f -> 1, no bias)
    p['wc'] = nrm((5, f), 1.0 / f ** 0.5)
    # 2 x CyclicalDecoder: Linear(f -> 2) + tanh
    p['wcog'] = nrm((f, 2), 1.0 / f ** 0.5)
    p['bcog'] = jnp.zeros((2,), F32)
    p['whead'] = nrm((f, 2), 1.0 / f ** 0.5)
    p['bhead'] = jnp.zeros((2,), F32)
    # SpatioDecoder: Linear(2f -> 1) x2, gamma_lambda, gamma_phi
    p['wlam'] = nrm((2 * f, 1), 1.0 / (2.0 * f) ** 0.5)
    p['blam'] = 0.0
    p['wphi'] = nrm((2 * f, 1), 1.0 / (2.0 * f) ** 0.5)
    p['bphi'] = 0.0
    p['gammas'] = (0.1, 0.1)
    # TemporalDecoder / NeuralPointProcess
    p['tw1'] = nrm((f, TEMP_HID), 1.0 / f ** 0.5)
    p['tb1'] = jnp.zeros((TEMP_HID,), F32)
    p['tw2'] = nrm((TEMP_HID, 1), 0.1 / TEMP_HID ** 0.5)   # xavier_normal_, gain=0.1
    p['tb2'] = 0.5                                          # bias init 0.5
    p['base_rate'] = 0.1
    # 4 x DiscreteDecoder
    disc = {}
    for name, C in zip(DISC_NAMES, c_list):
        disc[name] = {
            'w': nrm((f, D), 1.0 / f ** 0.5),
            'b': jnp.zeros((D,), F32),
            'proto': nrm((D, C), 1.0 / D ** 0.5),   # class_prototypes.weight [D, C]
            'temp': 1.0,
        }
    p['discrete'] = disc
    return p


def pack_merged_params(p, cont_scale, cont_shift):
    """Fold GatedFusionTwo + every head's first Linear into ONE merged matmul.

        H = sum_k (x_k @ Fw_k + Fb_k) @ W_k + b  =  x_flat @ W_merged + b_merged

    Continuous-head stats (x_hat = h*scale + shift) and the discrete
    1/temperature scaling are also folded in, so the kernel holds no constant
    arrays.  The discrete prototypes are packed block-diagonally so all four
    heads share one prototype matmul.
    """
    f = p['d_model']
    D = p['emb_dim']
    c_list = p['c_list']
    c_max = max(c_list)
    nh = HC_DISC + 4 * D

    wall = jnp.zeros((N_ATTR, f, nh), F32)      # per-attribute head first-Linear
    ball = jnp.zeros((1, nh), F32)
    # continuous: slots (1,2,3,7,8) -> cols 0..4, stats folded as scale/shift
    for i, sl in enumerate(CONT_SLOTS):
        wall = wall.at[sl, :, HC_CONT + i].set(p['wc'][i] * cont_scale[i])
        ball = ball.at[0, HC_CONT + i].set(cont_shift[i])
    # cyclical: cog (slot 9), heading (slot 10)
    wall = wall.at[9, :, HC_COG:HC_COG + 2].set(p['wcog'])
    ball = ball.at[0, HC_COG:HC_COG + 2].set(p['bcog'])
    wall = wall.at[10, :, HC_HEAD:HC_HEAD + 2].set(p['whead'])
    ball = ball.at[0, HC_HEAD:HC_HEAD + 2].set(p['bhead'])
    # spatio: cf = [e_lambda (slot 12) | e_phi (slot 11)]; col HC_SPAT = lambda
    wall = wall.at[12, :, HC_SPAT].set(p['wlam'][:f, 0])
    wall = wall.at[11, :, HC_SPAT].set(p['wlam'][f:, 0])
    wall = wall.at[12, :, HC_SPAT + 1].set(p['wphi'][:f, 0])
    wall = wall.at[11, :, HC_SPAT + 1].set(p['wphi'][f:, 0])
    ball = ball.at[0, HC_SPAT].set(p['blam'])
    ball = ball.at[0, HC_SPAT + 1].set(p['bphi'])
    # temporal: slot 13
    wall = wall.at[13, :, HC_TEMP:HC_TEMP + TEMP_HID].set(p['tw1'])
    ball = ball.at[0, HC_TEMP:HC_TEMP + TEMP_HID].set(p['tb1'])
    # discrete z: slots (0, 4, 5, 6); block-diagonal prototypes, 1/temp folded
    proto_bd = jnp.zeros((4 * D, 4 * c_max), F32)
    for h, (name, sl) in enumerate(zip(DISC_NAMES, DISC_SLOTS)):
        dp = p['discrete'][name]
        wall = wall.at[sl, :, HC_DISC + h * D:HC_DISC + (h + 1) * D].set(dp['w'])
        ball = ball.at[0, HC_DISC + h * D:HC_DISC + (h + 1) * D].set(dp['b'])
        proto_bd = proto_bd.at[h * D:(h + 1) * D,
                               h * c_max:h * c_max + c_list[h]].set(
            dp['proto'] / dp['temp'])

    # fold GatedFusionTwo into the head weights (one [14*5f, nh] matrix)
    w_merged = jnp.einsum('kif,kfn->kin', p['fusion_w'], wall)
    w_merged = w_merged.reshape(N_ATTR * TARGET_L * f, nh)
    b_merged = ball + jnp.einsum('kif,kfn->n', p['fusion_b'], wall)[None, :]

    return {'w': w_merged.astype(BF16), 'b': b_merged,
            'tw2': p['tw2'].reshape(1, TEMP_HID), 'proto': proto_bd}


# --------------------------------------------------------------------------
# full forward pass (mirrors HeterogeneousAttributeDecoder.forward)
# --------------------------------------------------------------------------
def heterogeneous_attribute_decoder_forward(params, data_status, input_list,
                                            raw_features, observed_data,
                                            continuous_ab_dict, b, s, u):
    D = params['emb_dim']
    c_list = params['c_list']
    c_max = max(c_list)
    bs = b * s

    # wrapper glue: fusion input already flattened to [bs, 14*5f]
    x_flat = build_fusion_input(input_list)

    # SpatioDecoder sliding-window bases (torch.no_grad path); pack base + u
    # into ONE narrow side operand -> a single extra DMA stream.
    lambda_base = sliding_window_base(observed_data[:, :, -2], 181.0)
    phi_base = sliding_window_base(observed_data[:, :, -3], 91.0)
    side = jnp.concatenate([lambda_base[:, None], phi_base[:, None], u,
                            jnp.zeros((bs, 5), F32)], axis=1)    # [bs, 8]

    # compile-time scalar constants (folded into the packed weights)
    cont_names = ('vessel_width', 'vessel_length', 'vessel_draught', 'sog', 'rot')
    ab_keys = ('width', 'length', 'draught', 'sog', 'rot')
    mu = [float(data_status[n + '_mean']) for n in cont_names]
    sig = [float(data_status[n + '_std']) for n in cont_names]
    alpha = [float(continuous_ab_dict[k][0]) for k in ab_keys]
    beta = [float(continuous_ab_dict[k][1]) for k in ab_keys]
    # mu + sigma*(h - beta)/alpha_safe  ==  h*scale + shift
    scale = [max(sg, 1e-6) / (max(a, 1e-6) + 1e-8) for sg, a in zip(sig, alpha)]
    shift = [m - sc * bt for m, sc, bt in zip(mu, scale, beta)]

    pp = pack_merged_params(params, scale, shift)   # NOTE: hoist out of the step loop in real use
    zoff, yoff, _, nc_pad = _out_layout(D, c_max)
    cfg = dict(emb_dim=D, c_list=c_list, c_max=c_max, gammas=params['gammas'],
               tb2=params['tb2'], base_rate=params['base_rate'],
               smoothing=params['smoothing'], max_delta=params['max_delta'],
               nc_pad=nc_pad)

    packed = fused_decoder_call(x_flat, pp, side, cfg)           # [bs, nc_pad]

    # unpack the lane-dense output slab
    continuous_hat = packed[:, 0:5]
    cog_hat = packed[:, 5:7]
    heading_hat = packed[:, 7:9]
    spatio_pred = packed[:, 9:11]
    delta_coord = packed[:, 11:13]
    time_tau = packed[:, 13:14]

    sigma_matrix = jnp.broadcast_to(jnp.array([sig], F32), (bs, 5)).reshape(b, s, -1)
    continuous_dict = {'continuous_hat': continuous_hat.reshape(b, s, -1),
                       'sigma_matrix': sigma_matrix}

    discrete_list = []
    for h, slot in enumerate(DISC_SLOTS):
        z = packed[:, zoff + h * D:zoff + (h + 1) * D]
        y = packed[:, yoff + h * c_max:yoff + h * c_max + c_list[h]]
        discrete_list.append({'x': raw_features[:, :, slot, :],
                              'z': z.reshape(b, s, -1),
                              'y': y.reshape(b, s, -1)})

    return ((spatio_pred.reshape(b, s, -1), delta_coord.reshape(b, s, -1)),
            time_tau.reshape(b, s, -1),
            cog_hat.reshape(b, s, -1),
            heading_hat.reshape(b, s, -1),
            continuous_dict,
            discrete_list)


# --------------------------------------------------------------------------
if __name__ == "__main__":
    key = jax.random.PRNGKey(0)
    b, s, f, D = 2, 16, 32, 16        # batch, seq, d_data_model, data_embedding_dim
    bs = b * s

    data_status = {
        'vessel_type_unique': list(range(4)),
        'destination_unique': list(range(9)),
        'cargo_type_unique': list(range(6)),
        'navi_status_unique': list(range(3)),
        'vessel_width_mean': 20.0, 'vessel_width_std': 5.0,
        'vessel_length_mean': 100.0, 'vessel_length_std': 30.0,
        'vessel_draught_mean': 7.0, 'vessel_draught_std': 2.0,
        'sog_mean': 10.0, 'sog_std': 4.0,
        'rot_mean': 0.0, 'rot_std': 1.0,
    }
    continuous_ab_dict = {k: (1.0, 0.0) for k in ['width', 'length', 'draught', 'sog', 'rot']}

    kp, k1, k2, k3, k4, ku = jax.random.split(key, 6)
    params = init_params(kp, f, D, data_status)

    # input_list: 7 attributes with l=3 (padded to 5) + 7 attributes with l=6 (cropped to 5)
    input_list = [
        jax.random.normal(k1, (bs, 7, 3, f), F32) * 0.5,
        jax.random.normal(k2, (bs, 7, 6, f), F32) * 0.5,
    ]
    raw_features = jax.random.normal(k3, (b, s, 14, 4), F32)
    observed_data = jax.random.normal(k4, (b, s, 6), F32) * 30.0
    # uniform samples for the point-process draw (matches torch.rand_like use)
    # TODO(synk): could instead draw in-kernel via pltpu.prng_seed/prng_random_bits.
    u = jax.random.uniform(ku, (bs, 1), F32) * (1.0 - 2e-7) + 1e-7

    result = heterogeneous_attribute_decoder_forward(
        params, data_status, input_list, raw_features, observed_data,
        continuous_ab_dict, b, s, u)
    jax.block_until_ready(result)
    print("KERNEL_OK")
</pallas_src>

<mosaic_0001>
module attributes {stable_mosaic.version = 11 : i64} {
  func.func @_decoder_kernel(%arg0: i32, %arg1: memref<16x2240xbf16, #tpu.memory_space<vmem>>, %arg2: memref<2240x192xbf16, #tpu.memory_space<vmem>>, %arg3: memref<1x192xf32, #tpu.memory_space<vmem>>, %arg4: memref<1x64xf32, #tpu.memory_space<vmem>>, %arg5: memref<64x40xf32, #tpu.memory_space<vmem>>, %arg6: memref<16x8xf32, #tpu.memory_space<vmem>>, %arg7: memref<16x128xf32, #tpu.memory_space<vmem>>) attributes {dimension_semantics = [#tpu.dimension_semantics<parallel>], iteration_bounds = array<i64: 2>, scalar_prefetch = 0 : i64, scratch_operands = 0 : i64, tpu.core_type = #tpu.core_type<tc>, window_params = [{transform_indices = @transform_0, window_bounds = array<i64: 16, 2240>}, {pipeline_mode = #tpu.pipeline_mode<synchronous>, transform_indices = @transform_1, window_bounds = array<i64: 2240, 192>}, {pipeline_mode = #tpu.pipeline_mode<synchronous>, transform_indices = @transform_2, window_bounds = array<i64: 1, 192>}, {pipeline_mode = #tpu.pipeline_mode<synchronous>, transform_indices = @transform_3, window_bounds = array<i64: 1, 64>}, {pipeline_mode = #tpu.pipeline_mode<synchronous>, transform_indices = @transform_4, window_bounds = array<i64: 64, 40>}, {transform_indices = @transform_5, window_bounds = array<i64: 16, 8>}, {transform_indices = @transform_6, window_bounds = array<i64: 16, 128>}]} {
    %c0 = arith.constant 0 : index
    %c0_0 = arith.constant 0 : index
    %0 = vector.load %arg1[%c0, %c0_0] : memref<16x2240xbf16, #tpu.memory_space<vmem>>, vector<16x2240xbf16>
    %c0_1 = arith.constant 0 : index
    %c0_2 = arith.constant 0 : index
    %1 = vector.load %arg2[%c0_1, %c0_2] : memref<2240x192xbf16, #tpu.memory_space<vmem>>, vector<2240x192xbf16>
    %cst = arith.constant dense<0.000000e+00> : vector<16x192xf32>
    %2 = tpu.matmul %0, %1, %cst {dimension_numbers = #tpu.dot_dimension_numbers<[1], [0], [0], [1], [0, 0, 1, 1], [], []>} : vector<16x2240xbf16>, vector<2240x192xbf16>, vector<16x192xf32> -> vector<16x192xf32>
    %c0_3 = arith.constant 0 : index
    %c0_4 = arith.constant 0 : index
    %3 = vector.load %arg3[%c0_3, %c0_4] : memref<1x192xf32, #tpu.memory_space<vmem>>, vector<1x192xf32>
    %4 = vector.broadcast %3 : vector<1x192xf32> to vector<16x192xf32>
    %5 = arith.addf %2, %4 : vector<16x192xf32>
    %6 = vector.extract_strided_slice %5 {offsets = [0, 0], sizes = [16, 5], strides = [1, 1]} : vector<16x192xf32> to vector<16x5xf32>
    %7 = vector.extract_strided_slice %5 {offsets = [0, 5], sizes = [16, 2], strides = [1, 1]} : vector<16x192xf32> to vector<16x2xf32>
    %8 = math.tanh %7 : vector<16x2xf32>
    %9 = vector.extract_strided_slice %5 {offsets = [0, 7], sizes = [16, 2], strides = [1, 1]} : vector<16x192xf32> to vector<16x2xf32>
    %10 = math.tanh %9 : vector<16x2xf32>
    %11 = vector.extract_strided_slice %5 {offsets = [0, 9], sizes = [16, 1], strides = [1, 1]} : vector<16x192xf32> to vector<16x1xf32>
    %12 = math.tanh %11 : vector<16x1xf32>
    %cst_5 = arith.constant 1.000000e-01 : f32
    %13 = vector.broadcast %cst_5 : f32 to vector<16x1xf32>
    %14 = arith.mulf %12, %13 : vector<16x1xf32>
    %15 = vector.extract_strided_slice %5 {offsets = [0, 10], sizes = [16, 1], strides = [1, 1]} : vector<16x192xf32> to vector<16x1xf32>
    %16 = math.tanh %15 : vector<16x1xf32>
    %cst_6 = arith.constant 1.000000e-01 : f32
    %17 = vector.broadcast %cst_6 : f32 to vector<16x1xf32>
    %18 = arith.mulf %16, %17 : vector<16x1xf32>
    %19 = tpu.concatenate %14, %18 in 1 : vector<16x1xf32>, vector<16x1xf32> -> vector<16x2xf32>
    %c0_7 = arith.constant 0 : index
    %c0_8 = arith.constant 0 : index
    %20 = vector.load %arg6[%c0_7, %c0_8] : memref<16x8xf32, #tpu.memory_space<vmem>>, vector<16x2xf32>
    %21 = arith.addf %20, %19 : vector<16x2xf32>
    %22 = vector.extract_strided_slice %5 {offsets = [0, 11], sizes = [16, 64], strides = [1, 1]} : vector<16x192xf32> to vector<16x64xf32>
    %cst_9 = arith.constant 0.000000e+00 : f32
    %23 = vector.broadcast %cst_9 : f32 to vector<16x64xf32>
    %24 = arith.subf %23, %22 : vector<16x64xf32>
    %25 = math.exp %24 : vector<16x64xf32>
    %cst_10 = arith.constant 1.000000e+00 : f32
    %26 = vector.broadcast %cst_10 : f32 to vector<16x64xf32>
    %27 = arith.addf %26, %25 : vector<16x64xf32>
    %28 = tpu.reciprocal %27 {approx = true} : vector<16x64xf32> -> vector<16x64xf32>
    %29 = arith.mulf %22, %28 : vector<16x64xf32>
    %c0_11 = arith.constant 0 : index
    %c0_12 = arith.constant 0 : index
    %30 = vector.load %arg4[%c0_11, %c0_12] : memref<1x64xf32, #tpu.memory_space<vmem>>, vector<1x64xf32>
    %31 = vector.broadcast %30 : vector<1x64xf32> to vector<16x64xf32>
    %32 = arith.mulf %29, %31 : vector<16x64xf32>
    %cst_13 = arith.constant dense<0.000000e+00> : vector<16xf32>
    %33 = vector.multi_reduction <add>, %32, %cst_13 [1] : vector<16x64xf32> to vector<16xf32>
    %34 = vector.shape_cast %33 : vector<16xf32> to vector<16x1xf32>
    %cst_14 = arith.constant 5.000000e-01 : f32
    %35 = vector.broadcast %cst_14 : f32 to vector<16x1xf32>
    %36 = arith.addf %34, %35 : vector<16x1xf32>
    %cst_15 = arith.constant 0.000000e+00 : f32
    %37 = vector.broadcast %cst_15 : f32 to vector<16x1xf32>
    %38 = arith.maximumf %36, %37 : vector<16x1xf32>
    %39 = math.absf %36 : vector<16x1xf32>
    %cst_16 = arith.constant 0.000000e+00 : f32
    %40 = vector.broadcast %cst_16 : f32 to vector<16x1xf32>
    %41 = arith.subf %40, %39 : vector<16x1xf32>
    %42 = math.exp %41 : vector<16x1xf32>
    %43 = math.log1p %42 : vector<16x1xf32>
    %44 = arith.addf %38, %43 : vector<16x1xf32>
    %cst_17 = arith.constant 1.000000e-01 : f32
    %45 = vector.broadcast %cst_17 : f32 to vector<16x1xf32>
    %46 = arith.addf %44, %45 : vector<16x1xf32>
    %cst_18 = arith.constant 1.000000e-07 : f32
    %47 = vector.broadcast %cst_18 : f32 to vector<16x1xf32>
    %48 = arith.maximumf %46, %47 : vector<16x1xf32>
    %c0_19 = arith.constant 0 : index
    %c2 = arith.constant 2 : index
    %49 = vector.load %arg6[%c0_19, %c2] : memref<16x8xf32, #tpu.memory_space<vmem>>, vector<16x1xf32>
    %50 = math.log %49 : vector<16x1xf32>
    %cst_20 = arith.constant 0.000000e+00 : f32
    %51 = vector.broadcast %cst_20 : f32 to vector<16x1xf32>
    %52 = arith.subf %51, %50 : vector<16x1xf32>
    %53 = tpu.reciprocal %48 {approx = true} : vector<16x1xf32> -> vector<16x1xf32>
    %54 = arith.mulf %52, %53 : vector<16x1xf32>
    %cst_21 = arith.constant 1.000000e-07 : f32
    %cst_22 = arith.constant 3.000000e+02 : f32
    %55 = vector.broadcast %cst_21 : f32 to vector<16x1xf32>
    %56 = arith.maximumf %55, %54 : vector<16x1xf32>
    %57 = vector.broadcast %cst_22 : f32 to vector<16x1xf32>
    %58 = arith.minimumf %57, %56 : vector<16x1xf32>
    %59 = vector.extract_strided_slice %5 {offsets = [0, 128], sizes = [16, 64], strides = [1, 1]} : vector<16x192xf32> to vector<16x64xf32>
    %c0_23 = arith.constant 0 : index
    %c0_24 = arith.constant 0 : index
    %60 = vector.load %arg5[%c0_23, %c0_24] : memref<64x40xf32, #tpu.memory_space<vmem>>, vector<64x40xf32>
    %cst_25 = arith.constant dense<0.000000e+00> : vector<16x40xf32>
    %61 = tpu.matmul %59, %60, %cst_25 {dimension_numbers = #tpu.dot_dimension_numbers<[1], [0], [0], [1], [0, 0, 1, 1], [], []>} : vector<16x64xf32>, vector<64x40xf32>, vector<16x40xf32> -> vector<16x40xf32>
    %62 = tpu.iota {dimensions = array<i32: 1>} : vector<16x10xi32>
    %c5_i32 = arith.constant 5 : i32
    %63 = vector.broadcast %c5_i32 : i32 to vector<16x10xi32>
    %64 = arith.cmpi slt, %62, %63 : vector<16x10xi32>
    %65 = vector.extract_strided_slice %61 {offsets = [0, 0], sizes = [16, 10], strides = [1, 1]} : vector<16x40xf32> to vector<16x10xf32>
    %cst_26 = arith.constant -1.000000e+30 : f32
    %66 = vector.broadcast %cst_26 : f32 to vector<16x10xf32>
    %67 = arith.select %64, %65, %66 : vector<16x10xi1>, vector<16x10xf32>
    %cst_27 = arith.constant dense<0xFF800000> : vector<16xf32>
    %68 = vector.multi_reduction <maximumf>, %67, %cst_27 [1] : vector<16x10xf32> to vector<16xf32>
    %69 = vector.shape_cast %68 : vector<16xf32> to vector<16x1xf32>
    %70 = vector.broadcast %69 : vector<16x1xf32> to vector<16x10xf32>
    %71 = arith.subf %67, %70 : vector<16x10xf32>
    %72 = math.exp %71 : vector<16x10xf32>
    %cst_28 = arith.constant 0.000000e+00 : f32
    %73 = vector.broadcast %cst_28 : f32 to vector<16x10xf32>
    %74 = arith.select %64, %72, %73 : vector<16x10xi1>, vector<16x10xf32>
    %cst_29 = arith.constant dense<0.000000e+00> : vector<16xf32>
    %75 = vector.multi_reduction <add>, %74, %cst_29 [1] : vector<16x10xf32> to vector<16xf32>
    %76 = vector.shape_cast %75 : vector<16xf32> to vector<16x1xf32>
    %77 = tpu.reciprocal %76 {approx = true} : vector<16x1xf32> -> vector<16x1xf32>
    %78 = vector.broadcast %77 : vector<16x1xf32> to vector<16x10xf32>
    %79 = arith.mulf %74, %78 : vector<16x10xf32>
    %cst_30 = arith.constant 0.899999976 : f32
    %80 = vector.broadcast %cst_30 : f32 to vector<16x10xf32>
    %81 = arith.mulf %80, %79 : vector<16x10xf32>
    %cst_31 = arith.constant 2.000000e-02 : f32
    %82 = vector.broadcast %cst_31 : f32 to vector<16x10xf32>
    %83 = arith.addf %81, %82 : vector<16x10xf32>
    %cst_32 = arith.constant 0.000000e+00 : f32
    %84 = vector.broadcast %cst_32 : f32 to vector<16x10xf32>
    %85 = arith.select %64, %83, %84 : vector<16x10xi1>, vector<16x10xf32>
    %c10_i32 = arith.constant 10 : i32
    %86 = vector.broadcast %c10_i32 : i32 to vector<16x10xi32>
    %87 = arith.cmpi slt, %62, %86 : vector<16x10xi32>
    %88 = vector.extract_strided_slice %61 {offsets = [0, 10], sizes = [16, 10], strides = [1, 1]} : vector<16x40xf32> to vector<16x10xf32>
    %cst_33 = arith.constant -1.000000e+30 : f32
    %89 = vector.broadcast %cst_33 : f32 to vector<16x10xf32>
    %90 = arith.select %87, %88, %89 : vector<16x10xi1>, vector<16x10xf32>
    %cst_34 = arith.constant dense<0xFF800000> : vector<16xf32>
    %91 = vector.multi_reduction <maximumf>, %90, %cst_34 [1] : vector<16x10xf32> to vector<16xf32>
    %92 = vector.shape_cast %91 : vector<16xf32> to vector<16x1xf32>
    %93 = vector.broadcast %92 : vector<16x1xf32> to vector<16x10xf32>
    %94 = arith.subf %90, %93 : vector<16x10xf32>
    %95 = math.exp %94 : vector<16x10xf32>
    %cst_35 = arith.constant 0.000000e+00 : f32
    %96 = vector.broadcast %cst_35 : f32 to vector<16x10xf32>
    %97 = arith.select %87, %95, %96 : vector<16x10xi1>, vector<16x10xf32>
    %cst_36 = arith.constant dense<0.000000e+00> : vector<16xf32>
    %98 = vector.multi_reduction <add>, %97, %cst_36 [1] : vector<16x10xf32> to vector<16xf32>
    %99 = vector.shape_cast %98 : vector<16xf32> to vector<16x1xf32>
    %100 = tpu.reciprocal %99 {approx = true} : vector<16x1xf32> -> vector<16x1xf32>
    %101 = vector.broadcast %100 : vector<16x1xf32> to vector<16x10xf32>
    %102 = arith.mulf %97, %101 : vector<16x10xf32>
    %cst_37 = arith.constant 0.899999976 : f32
    %103 = vector.broadcast %cst_37 : f32 to vector<16x10xf32>
    %104 = arith.mulf %103, %102 : vector<16x10xf32>
    %cst_38 = arith.constant 0.00999999977 : f32
    %105 = vector.broadcast %cst_38 : f32 to vector<16x10xf32>
    %106 = arith.addf %104, %105 : vector<16x10xf32>
    %cst_39 = arith.constant 0.000000e+00 : f32
    %107 = vector.broadcast %cst_39 : f32 to vector<16x10xf32>
    %108 = arith.select %87, %106, %107 : vector<16x10xi1>, vector<16x10xf32>
    %c7_i32 = arith.constant 7 : i32
    %109 = vector.broadcast %c7_i32 : i32 to vector<16x10xi32>
    %110 = arith.cmpi slt, %62, %109 : vector<16x10xi32>
    %111 = vector.extract_strided_slice %61 {offsets = [0, 20], sizes = [16, 10], strides = [1, 1]} : vector<16x40xf32> to vector<16x10xf32>
    %cst_40 = arith.constant -1.000000e+30 : f32
    %112 = vector.broadcast %cst_40 : f32 to vector<16x10xf32>
    %113 = arith.select %110, %111, %112 : vector<16x10xi1>, vector<16x10xf32>
    %cst_41 = arith.constant dense<0xFF800000> : vector<16xf32>
    %114 = vector.multi_reduction <maximumf>, %113, %cst_41 [1] : vector<16x10xf32> to vector<16xf32>
    %115 = vector.shape_cast %114 : vector<16xf32> to vector<16x1xf32>
    %116 = vector.broadcast %115 : vector<16x1xf32> to vector<16x10xf32>
    %117 = arith.subf %113, %116 : vector<16x10xf32>
    %118 = math.exp %117 : vector<16x10xf32>
    %cst_42 = arith.constant 0.000000e+00 : f32
    %119 = vector.broadcast %cst_42 : f32 to vector<16x10xf32>
    %120 = arith.select %110, %118, %119 : vector<16x10xi1>, vector<16x10xf32>
    %cst_43 = arith.constant dense<0.000000e+00> : vector<16xf32>
    %121 = vector.multi_reduction <add>, %120, %cst_43 [1] : vector<16x10xf32> to vector<16xf32>
    %122 = vector.shape_cast %121 : vector<16xf32> to vector<16x1xf32>
    %123 = tpu.reciprocal %122 {approx = true} : vector<16x1xf32> -> vector<16x1xf32>
    %124 = vector.broadcast %123 : vector<16x1xf32> to vector<16x10xf32>
    %125 = arith.mulf %120, %124 : vector<16x10xf32>
    %cst_44 = arith.constant 0.899999976 : f32
    %126 = vector.broadcast %cst_44 : f32 to vector<16x10xf32>
    %127 = arith.mulf %126, %125 : vector<16x10xf32>
    %cst_45 = arith.constant 0.0142857144 : f32
    %128 = vector.broadcast %cst_45 : f32 to vector<16x10xf32>
    %129 = arith.addf %127, %128 : vector<16x10xf32>
    %cst_46 = arith.constant 0.000000e+00 : f32
    %130 = vector.broadcast %cst_46 : f32 to vector<16x10xf32>
    %131 = arith.select %110, %129, %130 : vector<16x10xi1>, vector<16x10xf32>
    %c4_i32 = arith.constant 4 : i32
    %132 = vector.broadcast %c4_i32 : i32 to vector<16x10xi32>
    %133 = arith.cmpi slt, %62, %132 : vector<16x10xi32>
    %134 = vector.extract_strided_slice %61 {offsets = [0, 30], sizes = [16, 10], strides = [1, 1]} : vector<16x40xf32> to vector<16x10xf32>
    %cst_47 = arith.constant -1.000000e+30 : f32
    %135 = vector.broadcast %cst_47 : f32 to vector<16x10xf32>
    %136 = arith.select %133, %134, %135 : vector<16x10xi1>, vector<16x10xf32>
    %cst_48 = arith.constant dense<0xFF800000> : vector<16xf32>
    %137 = vector.multi_reduction <maximumf>, %136, %cst_48 [1] : vector<16x10xf32> to vector<16xf32>
    %138 = vector.shape_cast %137 : vector<16xf32> to vector<16x1xf32>
    %139 = vector.broadcast %138 : vector<16x1xf32> to vector<16x10xf32>
    %140 = arith.subf %136, %139 : vector<16x10xf32>
    %141 = math.exp %140 : vector<16x10xf32>
    %cst_49 = arith.constant 0.000000e+00 : f32
    %142 = vector.broadcast %cst_49 : f32 to vector<16x10xf32>
    %143 = arith.select %133, %141, %142 : vector<16x10xi1>, vector<16x10xf32>
    %cst_50 = arith.constant dense<0.000000e+00> : vector<16xf32>
    %144 = vector.multi_reduction <add>, %143, %cst_50 [1] : vector<16x10xf32> to vector<16xf32>
    %145 = vector.shape_cast %144 : vector<16xf32> to vector<16x1xf32>
    %146 = tpu.reciprocal %145 {approx = true} : vector<16x1xf32> -> vector<16x1xf32>
    %147 = vector.broadcast %146 : vector<16x1xf32> to vector<16x10xf32>
    %148 = arith.mulf %143, %147 : vector<16x10xf32>
    %cst_51 = arith.constant 0.899999976 : f32
    %149 = vector.broadcast %cst_51 : f32 to vector<16x10xf32>
    %150 = arith.mulf %149, %148 : vector<16x10xf32>
    %cst_52 = arith.constant 2.500000e-02 : f32
    %151 = vector.broadcast %cst_52 : f32 to vector<16x10xf32>
    %152 = arith.addf %150, %151 : vector<16x10xf32>
    %cst_53 = arith.constant 0.000000e+00 : f32
    %153 = vector.broadcast %cst_53 : f32 to vector<16x10xf32>
    %154 = arith.select %133, %152, %153 : vector<16x10xi1>, vector<16x10xf32>
    %cst_54 = arith.constant 0.000000e+00 : f32
    %155 = vector.broadcast %cst_54 : f32 to vector<16x10xf32>
    %156 = tpu.concatenate %6, %8, %10, %21, %19, %58, %59, %85, %108, %131, %154, %155 in 1 : vector<16x5xf32>, vector<16x2xf32>, vector<16x2xf32>, vector<16x2xf32>, vector<16x2xf32>, vector<16x1xf32>, vector<16x64xf32>, vector<16x10xf32>, vector<16x10xf32>, vector<16x10xf32>, vector<16x10xf32>, vector<16x10xf32> -> vector<16x128xf32>
    %c0_55 = arith.constant 0 : index
    %c0_56 = arith.constant 0 : index
    %157 = vector.load %arg7[%c0_55, %c0_56] : memref<16x128xf32, #tpu.memory_space<vmem>>, vector<16x128xf32>
    tpu.vector_store %arg7[%c0_55, %c0_56], %156 {strides = array<i32>} : memref<16x128xf32, #tpu.memory_space<vmem>>, vector<16x128xf32>,
    return
  }
  func.func @transform_0(%arg0: i32) -> (i32, i32) {
    %c0_i32 = arith.constant 0 : i32
    %c0_i32_0 = arith.constant 0 : i32
    return %arg0, %c0_i32 : i32, i32
  }
  func.func @transform_1(%arg0: i32) -> (i32, i32) {
    %c0_i32 = arith.constant 0 : i32
    %c0_i32_0 = arith.constant 0 : i32
    %c0_i32_1 = arith.constant 0 : i32
    return %c0_i32, %c0_i32_0 : i32, i32
  }
  func.func @transform_2(%arg0: i32) -> (i32, i32) {
    %c0_i32 = arith.constant 0 : i32
    %c0_i32_0 = arith.constant 0 : i32
    %c0_i32_1 = arith.constant 0 : i32
    return %c0_i32, %c0_i32_0 : i32, i32
  }
  func.func @transform_3(%arg0: i32) -> (i32, i32) {
    %c0_i32 = arith.constant 0 : i32
    %c0_i32_0 = arith.constant 0 : i32
    %c0_i32_1 = arith.constant 0 : i32
    return %c0_i32, %c0_i32_0 : i32, i32
  }
  func.func @transform_4(%arg0: i32) -> (i32, i32) {
    %c0_i32 = arith.constant 0 : i32
    %c0_i32_0 = arith.constant 0 : i32
    %c0_i32_1 = arith.constant 0 : i32
    return %c0_i32, %c0_i32_0 : i32, i32
  }
  func.func @transform_5(%arg0: i32) -> (i32, i32) {
    %c0_i32 = arith.constant 0 : i32
    %c0_i32_0 = arith.constant 0 : i32
    return %arg0, %c0_i32 : i32, i32
  }
  func.func @transform_6(%arg0: i32) -> (i32, i32) {
    %c0_i32 = arith.constant 0 : i32
    %c0_i32_0 = arith.constant 0 : i32
    return %arg0, %c0_i32 : i32, i32
  }
}

</mosaic_0001>

<bundles_post_ra>
// kernel: tpu_custom_call.1
= control target key start
LH: loop header
LB: loop body
LE: loop exit
PB: predicated region body
PF: predicated region fallthrough
CT: control target
= control target key end

     0   :  { %11 = vsyncpa [#allocation3], 0  ;;  %s5204_s0 = inlined_call_operand.vmem [shape: bf16[32,2240], index: 0, kind: input, shape index: {}]   ;;  %s5205_s1 = inlined_call_operand.vmem [shape: bf16[2240,192], index: 1, kind: input, shape index: {}]   ;;  %s5206_s2 = inlined_call_operand.vmem [shape: f32[1,192], index: 2, kind: input, shape index: {}]   ;;  %s5207_s3 = inlined_call_operand.vmem [shape: f32[1,64], index: 3, kind: input, shape index: {}]   ;;  %s5208_s4 = inlined_call_operand.vmem [shape: f32[64,40], index: 4, kind: input, shape index: {}]   ;;  %s5209_s5 = inlined_call_operand.vmem [shape: f32[32,8], index: 5, kind: input, shape index: {}]   ;;  %s5210_s6 = inlined_call_operand.hbm [shape: f32[32,128], index: 6, kind: output, shape index: {}]  }
   0x1   :  { %13 = vsyncpa [#allocation3 + $0x1], 0  ;;  %s4016_s21 = smov 0   ;;  %s4018_s22 = smov 0  }
   0x2   :  { %s4020_s23 = smov 0   ;;  %s4022_s24 = smov 0  }
   0x3 LB: > { %s4037_s25 = sadd.s32 4294967295, %s3966_s24   ;;  %s3001_s26 = sadd.s32 4294967294, %s3966_s24   ;;  %s3966_s24 = sphi %s4022_s24, %s5216_s24   ;;  %s3962_s23 = sphi %s4020_s23, %s5215_s23   ;;  %s3958_s22 = sphi %s4018_s22, %s5214_s22   ;;  %s3954_s21 = sphi %s4016_s21, %s5213_s21  }
   0x4   : > { %s4041_s27 = sadd.s32 1, %s3966_s24   ;;  %s162_s28 = sadd.s32 1, %s3962_s23 }
   0x5   : > { %s159_s29 = ssub.s32 %s3966_s24, %s4041_s27  ;;  %p172_p0 = scmp.ne.s32.totalorder %s3962_s23, %s3958_s22 }
   0x6   : > { %p160_p1 = scmp.eq.s32.totalorder %s159_s29, 0  ;;  %p173_p2 = scmp.eq.s32.totalorder %s4037_s25, 1 }
   0x7   : > { %p178_p3 = scmp.ne.s32.totalorder %s3958_s22, %s3954_s21  ;;  %p179_p4 = scmp.eq.s32.totalorder %s3001_s26, 1 }
   0x8   : > { %s4052_s30 = scalar_select %p160_p1, %s3962_s23, %s162_s28  }
   0x9   : > { %p4054_p5 = por %p173_p2, %p172_p0  ;;  %p4058_p6 = por %p179_p4, %p178_p3 }
   0xa   : > { %p3004_p7 = scmp.ge.s32.totalorder %s3966_s24, 1  ;;  %p228_p8 = scmp.lt.s32.totalorder %s3966_s24, 3 }
   0xc   : > { %p229_p9 = pnand %p3004_p7, %p228_p8 }
   0xd   : > { %s3006_s28 = sshll.u32 (!%p229_p9), %s4037_s25, 1  ;;  %s3968_s19 = smov (!%p229_p9), 11  }
   0xe   : > { %232 = sbr.rel (%p229_p9) target bundleno = 1308 (0x51c), region = 44  ;;  %p265_p10 = scmp.lt.s32.totalorder (!%p229_p9), %s3006_s28, 3 }
   0xf   : > { %s3969_s14 = smov (!%p229_p9), 108   ;;  %s3970_s15 = smov (!%p229_p9), 118  }
  0x10   : > { %s3971_s17 = smov (!%p229_p9), 98   ;;  %s3972_s18 = smov (!%p229_p9), 117  }
  0x11   : > { %s3973_s20 = smov (!%p229_p9), 119   ;;  %s3975_s10 = smov (!%p229_p9), 14  }
  0x12   : > { %s3977_s11 = smov (!%p229_p9), 88   ;;  %s261_s12 = sand.u32 (!%p229_p9), 1, %s3958_s22  }
  0x13   : > { %v3399_v0 = vld [vmem:[%s5205_s1 + $0x74] ss:$8 sps:$4 sm:$0xff]   ;;  %v3401_v1 = vld [vmem:[%s5205_s1 + $0x70] ss:$8 sps:$4 sm:$0xff]   ;;  %v3405_v4 = vld [vmem:[%s5205_s1 + $0x64] ss:$8 sps:$4 sm:$0xff]  }
  0x14   : > { %2082 = vmatprep.subr.bf16.mxu0 %v3399_v0  ;;  %v3402_v2 = vld [vmem:[%s5205_s1 + $0x174] ss:$8 sps:$4 sm:$0xff]   ;;  %v3404_v3 = vld [vmem:[%s5205_s1 + $0x170] ss:$8 sps:$4 sm:$0xff]   ;;  %v3407_v5 = vld [vmem:[%s5205_s1 + $0x60] ss:$8 sps:$4 sm:$0xff]  }
  0x15   : > { %2083 = vmatpush1.bf16.msra.mxu0 %v3401_v1  ;;  %2125 = vmatprep.subr.bf16.mxu1 %v3402_v2  ;;  %v3408_v6 = vld [vmem:[%s5205_s1 + $0x164] ss:$8 sps:$4 sm:$0xff]   ;;  %v3410_v7 = vld [vmem:[%s5205_s1 + $0x160] ss:$8 sps:$4 sm:$0xff]   ;;  %v3411_v8 = vld [vmem:[%s5205_s1 + $0x54] ss:$8 sps:$4 sm:$0xff]  }
  0x16   : > { %2126 = vmatpush1.bf16.msra.mxu1 %v3404_v3  ;;  %2084 = vmatprep.subr.bf16.mxu0 %v3405_v4  ;;  %v3413_v9 = vld [vmem:[%s5205_s1 + $0x50] ss:$8 sps:$4 sm:$0xff]   ;;  %v3414_v10 = vld [vmem:[%s5205_s1 + $0x154] ss:$8 sps:$4 sm:$0xff]   ;;  %v3417_v11 = vld [vmem:[%s5205_s1 + $0x44] ss:$8 sps:$4 sm:$0xff]  }
  0x17   : > { %2127 = vmatprep.subr.bf16.mxu1 %v3408_v6  ;;  %v3416_v12 = vld [vmem:[%s5205_s1 + $0x150] ss:$8 sps:$4 sm:$0xff]   ;;  %v3420_v13 = vld [vmem:[%s5205_s1 + $0x144] ss:$8 sps:$4 sm:$0xff]   ;;  %v3419_v14 = vld [vmem:[%s5205_s1 + $0x40] ss:$8 sps:$4 sm:$0xff]  }
  0x18   : > { %v3423_v15 = vld [vmem:[%s5205_s1 + $0x34] ss:$8 sps:$4 sm:$0xff]   ;;  %v3422_v16 = vld [vmem:[%s5205_s1 + $0x140] ss:$8 sps:$4 sm:$0xff]   ;;  %v3425_v18 = vld [vmem:[%s5205_s1 + $0x30] ss:$8 sps:$4 sm:$0xff]  }
  0x19   : > { %2085 = vmatpush1.bf16.msra.mxu0 %v3407_v5  ;;  %v3426_v17 = vld [vmem:[%s5205_s1 + $0x134] ss:$8 sps:$4 sm:$0xff]   ;;  %v3429_v19 = vld [vmem:[%s5205_s1 + $0x24] ss:$8 sps:$4 sm:$0xff]   ;;  %v3428_v20 = vld [vmem:[%s5205_s1 + $0x130] ss:$8 sps:$4 sm:$0xff]  }
  0x1a   : > { %2086 = vmatprep.subr.bf16.mxu0 %v3411_v8  ;;  %2128 = vmatpush1.bf16.msra.mxu1 %v3410_v7  ;;  %v3432_v21 = vld [vmem:[%s5205_s1 + $0x124] ss:$8 sps:$4 sm:$0xff]   ;;  %v3431_v22 = vld [vmem:[%s5205_s1 + $0x20] ss:$8 sps:$4 sm:$0xff]   ;;  %v3435_v23 = vld [vmem:[%s5205_s1 + $0x14] ss:$8 sps:$4 sm:$0xff]  }
  0x1b   : > { %2129 = vmatprep.subr.bf16.mxu1 %v3414_v10  ;;  %v3434_v24 = vld [vmem:[%s5205_s1 + $0x120] ss:$8 sps:$4 sm:$0xff]   ;;  %v3438_v25 = vld [vmem:[%s5205_s1 + $0x114] ss:$8 sps:$4 sm:$0xff]   ;;  %v3437_v26 = vld [vmem:[%s5205_s1 + $0x10] ss:$8 sps:$4 sm:$0xff]  }
  0x1c   : > { %v3441_v27 = vld [vmem:[%s5205_s1 + $0x4] ss:$8 sps:$4 sm:$0xff]   ;;  %v3440_v28 = vld [vmem:[%s5205_s1 + $0x110] ss:$8 sps:$4 sm:$0xff]   ;;  %v3443_v30 = vld [vmem:[%s5205_s1] ss:$8 sps:$4 sm:$0xff]  }
  0x1d   : > { %2087 = vmatpush1.bf16.msra.mxu0 %v3413_v9  ;;  %v3444_v29 = vld [vmem:[%s5205_s1 + $0x104] ss:$8 sps:$4 sm:$0xff]   ;;  %v3447_v31 = vld [vmem:[%s5205_s1 + $0xf4] ss:$8 sps:$4 sm:$0xff]   ;;  %v3446_v32 = vld [vmem:[%s5205_s1 + $0x100] ss:$8 sps:$4 sm:$0xff]  }
  0x1e   : > { %2088 = vmatprep.subr.bf16.mxu0 %v3417_v11  ;;  %2130 = vmatpush1.bf16.msra.mxu1 %v3416_v12  ;;  %v3450_v33 = vld [vmem:[%s5205_s1 + $0x1f4] ss:$8 sps:$4 sm:$0xff]   ;;  %v3449_v34 = vld [vmem:[%s5205_s1 + $0xf0] ss:$8 sps:$4 sm:$0xff]   ;;  %v3453_v35 = vld [vmem:[%s5205_s1 + $0xe4] ss:$8 sps:$4 sm:$0xff]  }
  0x1f   : > { %2131 = vmatprep.subr.bf16.mxu1 %v3420_v13  ;;  %s5218_s28 = smov (!%p265_p10, %s3006_s28), 3  ;;  %v3452_v36 = vld [vmem:[%s5205_s1 + $0x1f0] ss:$8 sps:$4 sm:$0xff]   ;;  %v3456_v37 = vld [vmem:[%s5205_s1 + $0x1e4] ss:$8 sps:$4 sm:$0xff]   ;;  %vm2078_vm0 = vcmask 523264  }
  0x20   : > { %v3455_v38 = vld [vmem:[%s5205_s1 + $0xe0] ss:$8 sps:$4 sm:$0xff]   ;;  %v3459_v39 = vld [vmem:[%s5205_s1 + $0xd4] ss:$8 sps:$4 sm:$0xff]   ;;  %s3347_s16 = smul.u32 72, %s5218_s28  ;;  %vm2878_vm1 = vcmask 39936  }
  0x21   : > { %2089 = vmatpush1.bf16.msra.mxu0 %v3419_v14  ;;  %v3458_v40 = vld [vmem:[%s5205_s1 + $0x1e0] ss:$8 sps:$4 sm:$0xff]   ;;  %v3462_v41 = vld [vmem:[%s5205_s1 + $0x1d4] ss:$8 sps:$4 sm:$0xff]   ;;  %v3461_v42 = vld [vmem:[%s5205_s1 + $0xd0] ss:$8 sps:$4 sm:$0xff]  }
  0x22   : > { %2090 = vmatprep.subr.bf16.mxu0 %v3423_v15  ;;  %2132 = vmatpush1.bf16.msra.mxu1 %v3422_v16  ;;  %v3465_v43 = vld [vmem:[%s5205_s1 + $0xc4] ss:$8 sps:$4 sm:$0xff]   ;;  %s4203_s13 = scalar_lea.vmem %s5204_s0, %s3347_s16  ;;  %v3464_v44 = vld [vmem:[%s5205_s1 + $0x1d0] ss:$8 sps:$4 sm:$0xff]   ;;  %v3467_v46 = vld [vmem:[%s5205_s1 + $0xc0] ss:$8 sps:$4 sm:$0xff]  }
  0x23   : > { %2133 = vmatprep.subr.bf16.mxu1 %v3426_v17  ;;  %v3468_v45 = vld [vmem:[%s5205_s1 + $0x1c4] ss:$8 sps:$4 sm:$0xff]   ;;  %v3471_v48 = vld [vmem:[%s5205_s1 + $0xb4] ss:$8 sps:$4 sm:$0xff]   ;;  %v3470_v49 = vld [vmem:[%s5205_s1 + $0x1c0] ss:$8 sps:$4 sm:$0xff]  }
  0x24   : > { %v3496_v47 = vld [vmem:[%s4203_s13 + $0x4] ss:$72 sps:$4 sm:$0xff]   ;;  %v3474_v50 = vld [vmem:[%s5205_s1 + $0x1b4] ss:$8 sps:$4 sm:$0xff]   ;;  %v3473_v52 = vld [vmem:[%s5205_s1 + $0xb0] ss:$8 sps:$4 sm:$0xff]  }
  0x25   : > { %2091 = vmatpush1.bf16.msra.mxu0 %v3425_v18  ;;  %2114 = vmatprep.mubr.bf16.mxu0 %v3496_v47  ;;  %v3503_v51 = vld [vmem:[%s4203_s13 + $0xc] ss:$72 sps:$4 sm:$0xff]   ;;  %v3476_v54 = vld [vmem:[%s5205_s1 + $0x1b0] ss:$8 sps:$4 sm:$0xff]   ;;  %v3479_v56 = vld [vmem:[%s5205_s1 + $0xa0] ss:$8 sps:$4 sm:$0xff]  }
  0x26   : > { %2092 = vmatprep.subr.bf16.mxu0 %v3429_v19  ;;  %2134 = vmatpush1.bf16.msra.mxu1 %v3428_v20  ;;  %v3477_v53 = vld [vmem:[%s5205_s1 + $0xa4] ss:$8 sps:$4 sm:$0xff]   ;;  %v3483_v57 = vld [vmem:[%s5205_s1 + $0x94] ss:$8 sps:$4 sm:$0xff]   ;;  %v3482_v58 = vld [vmem:[%s5205_s1 + $0x1a0] ss:$8 sps:$4 sm:$0xff]  }
  0x27   : > { %2135 = vmatprep.subr.bf16.mxu1 %v3432_v21  ;;  %2157 = vmatprep.mubr.bf16.mxu1 %v3503_v51  ;;  %v3480_v55 = vld [vmem:[%s5205_s1 + $0x1a4] ss:$8 sps:$4 sm:$0xff]   ;;  %v3486_v59 = vld [vmem:[%s5205_s1 + $0x194] ss:$8 sps:$4 sm:$0xff]   ;;  %v3485_v60 = vld [vmem:[%s5205_s1 + $0x90] ss:$8 sps:$4 sm:$0xff]  }
  0x28   : > { %v3489_v61 = vld [vmem:[%s5205_s1 + $0x84] ss:$8 sps:$4 sm:$0xff]   ;;  %v3488_v62 = vld [vmem:[%s5205_s1 + $0x190] ss:$8 sps:$4 sm:$0xff]   ;;  %v3491_v0 = vld [vmem:[%s5205_s1 + $0x80] ss:$8 sps:$4 sm:$0xff]  }
  0x29   : > { %2093 = vmatpush1.bf16.msra.mxu0 %v3431_v22  ;;  %v3492_v63 = vld [vmem:[%s5205_s1 + $0x184] ss:$8 sps:$4 sm:$0xff]   ;;  %v3500_v1 = vld [vmem:[%s5205_s1 + $0x274] ss:$8 sps:$4 sm:$0xff]   ;;  %v3497_v2 = vld [vmem:[%s5205_s1 + $0x180] ss:$8 sps:$4 sm:$0xff]  }
  0x2a   : > { %2094 = vmatprep.subr.bf16.mxu0 %v3435_v23  ;;  %2136 = vmatpush1.bf16.msra.mxu1 %v3434_v24  ;;  %v3494_v3 = vld [vmem:[%s4203_s13] ss:$72 sps:$4 sm:$0xff]   ;;  %v3506_v4 = vld [vmem:[%s5205_s1 + $0x374] ss:$8 sps:$4 sm:$0xff]   ;;  %v3498_v5 = vld [vmem:[%s5205_s1 + $0x270] ss:$8 sps:$4 sm:$0xff]  }
  0x2b   : > { %2137 = vmatprep.subr.bf16.mxu1 %v3438_v25  ;;  %v3501_v6 = vld [vmem:[%s4203_s13 + $0x8] ss:$72 sps:$4 sm:$0xff]   ;;  %v3509_v7 = vld [vmem:[%s5205_s1 + $0x264] ss:$8 sps:$4 sm:$0xff]   ;;  %v3515_v11 = vld [vmem:[%s5205_s1 + $0x254] ss:$8 sps:$4 sm:$0xff]  }
  0x2c   : > { %v3504_v8 = vld [vmem:[%s5205_s1 + $0x370] ss:$8 sps:$4 sm:$0xff]   ;;  %v3512_v9 = vld [vmem:[%s5205_s1 + $0x364] ss:$8 sps:$4 sm:$0xff]   ;;  %v3507_v10 = vld [vmem:[%s5205_s1 + $0x260] ss:$8 sps:$4 sm:$0xff]  }
  0x2d   : > { %2095 = vmatpush1.bf16.msra.mxu0 %v3437_v26  ;;  %v3510_v12 = vld [vmem:[%s5205_s1 + $0x360] ss:$8 sps:$4 sm:$0xff]   ;;  %v3518_v13 = vld [vmem:[%s5205_s1 + $0x354] ss:$8 sps:$4 sm:$0xff]   ;;  %v3513_v14 = vld [vmem:[%s5205_s1 + $0x250] ss:$8 sps:$4 sm:$0xff]  }
  0x2e   : > { %2096 = vmatprep.subr.bf16.mxu0 %v3441_v27  ;;  %2138 = vmatpush1.bf16.msra.mxu1 %v3440_v28  ;;  %v3521_v15 = vld [vmem:[%s5205_s1 + $0x244] ss:$8 sps:$4 sm:$0xff]   ;;  %v3516_v16 = vld [vmem:[%s5205_s1 + $0x350] ss:$8 sps:$4 sm:$0xff]   ;;  %v3519_v18 = vld [vmem:[%s5205_s1 + $0x240] ss:$8 sps:$4 sm:$0xff]  }
  0x2f   : > { %2139 = vmatprep.subr.bf16.mxu1 %v3444_v29  ;;  %v3524_v17 = vld [vmem:[%s5205_s1 + $0x344] ss:$8 sps:$4 sm:$0xff]   ;;  %v3527_v19 = vld [vmem:[%s5205_s1 + $0x234] ss:$8 sps:$4 sm:$0xff]   ;;  %v3522_v20 = vld [vmem:[%s5205_s1 + $0x340] ss:$8 sps:$4 sm:$0xff]  }
  0x30   : > { %v3530_v21 = vld [vmem:[%s5205_s1 + $0x334] ss:$8 sps:$4 sm:$0xff]   ;;  %v3525_v22 = vld [vmem:[%s5205_s1 + $0x230] ss:$8 sps:$4 sm:$0xff]   ;;  %v3533_v23 = vld [vmem:[%s5205_s1 + $0x224] ss:$8 sps:$4 sm:$0xff]  }
  0x31   : > { %2097 = vmatpush1.bf16.msra.mxu0 %v3443_v30  ;;  %v3528_v24 = vld [vmem:[%s5205_s1 + $0x330] ss:$8 sps:$4 sm:$0xff]   ;;  %v3536_v25 = vld [vmem:[%s5205_s1 + $0x324] ss:$8 sps:$4 sm:$0xff]   ;;  %v3531_v26 = vld [vmem:[%s5205_s1 + $0x220] ss:$8 sps:$4 sm:$0xff]  }
  0x32   : > { %2098 = vmatprep.subr.bf16.mxu0 %v3447_v31  ;;  %2140 = vmatpush1.bf16.msra.mxu1 %v3446_v32  ;;  %v3539_v27 = vld [vmem:[%s5205_s1 + $0x214] ss:$8 sps:$4 sm:$0xff]   ;;  %v3534_v28 = vld [vmem:[%s5205_s1 + $0x320] ss:$8 sps:$4 sm:$0xff]   ;;  %v3537_v30 = vld [vmem:[%s5205_s1 + $0x210] ss:$8 sps:$4 sm:$0xff]  }
  0x33   : > { %2141 = vmatprep.subr.bf16.mxu1 %v3450_v33  ;;  %v3542_v29 = vld [vmem:[%s5205_s1 + $0x314] ss:$8 sps:$4 sm:$0xff]   ;;  %v3540_v31 = vld [vmem:[%s5205_s1 + $0x310] ss:$8 sps:$4 sm:$0xff]   ;;  %v3545_v32 = vld [vmem:[%s5205_s1 + $0x204] ss:$8 sps:$4 sm:$0xff]  }
  0x34   : > { %v3599_v33 = vld [vmem:[%s4203_s13 + $0x14] ss:$72 sps:$4 sm:$0xff]   ;;  %v3572_v51 = vld [vmem:[%s5205_s1 + $0x3c4] ss:$8 sps:$4 sm:$0xff]   ;;  %vm2881_vm2 = vcmask 56320   ;;  %vm2666_vm4 = vcmask 80896  }
  0x35   : > { %2099 = vmatpush2.bf16.msra.mxu0 %v3449_v34  ;;  %v3548_v34 = vld [vmem:[%s5205_s1 + $0x304] ss:$8 sps:$4 sm:$0xff]   ;;  %v3566_v47 = vld [vmem:[%s5205_s1 + $0x3d4] ss:$8 sps:$4 sm:$0xff]   ;;  %s3009_s16 = sshll.u32 %s5218_s28, 3  ;;  %s3974_s28 = smov 9  }
  0x36   : > { %2100 = vmatprep.subr.bf16.mxu0 %v3453_v35  ;;  %2142 = vmatpush2.bf16.msra.mxu1 %v3452_v36  ;;  %v3543_v35 = vld [vmem:[%s5205_s1 + $0x200] ss:$8 sps:$4 sm:$0xff]   ;;  %v3605_v36 = vld [vmem:[%s4203_s13 + $0x1c] ss:$72 sps:$4 sm:$0xff]   ;;  %s275_s9 = scalar_lea.vmem %s5209_s5, %s3009_s16  ;;  %vm2884_vm10 = vcmask 72704   ;;  %vm2887_vm11 = vcmask 89088  }
  0x37   : > { %2143 = vmatprep.subr.bf16.mxu1 %v3456_v37  ;;  %v3551_v37 = vld [vmem:[%s5205_s1 + $0x2f4] ss:$8 sps:$4 sm:$0xff]   ;;  %vm2890_vm12 = vcmask 105472   ;;  %vm2893_vm13 = vcmask 113664   ;;  %vm2896_vm14 = vcmask 637952   ;;  %vm2899_vm15 = vcmask 719872  }
  0x38   : > { %s3978_s29 = smov [#allocation2]  }
  0x39   : > { %2101 = vmatpush2.bf16.msra.mxu0 %v3455_v38  ;;  %v3546_v38 = vld [vmem:[%s5205_s1 + $0x300] ss:$8 sps:$4 sm:$0xff]  }
  0x3a   : > { %2102 = vmatprep.subr.bf16.mxu0 %v3459_v39  ;;  %2144 = vmatpush2.bf16.msra.mxu1 %v3458_v40  ;;  %v3554_v39 = vld [vmem:[%s5205_s1 + $0x3f4] ss:$8 sps:$4 sm:$0xff]   ;;  %v3549_v40 = vld [vmem:[%s5205_s1 + $0x2f0] ss:$8 sps:$4 sm:$0xff]  }
  0x3b   : > { %2145 = vmatprep.subr.bf16.mxu1 %v3462_v41  ;;  %v3557_v41 = vld [vmem:[%s5205_s1 + $0x2e4] ss:$8 sps:$4 sm:$0xff]  }
  0x3d   : > { %2103 = vmatpush2.bf16.msra.mxu0 %v3461_v42  ;;  %v3552_v42 = vld [vmem:[%s5205_s1 + $0x3f0] ss:$8 sps:$4 sm:$0xff]  }
  0x3e   : > { %2104 = vmatprep.subr.bf16.mxu0 %v3465_v43  ;;  %2146 = vmatpush2.bf16.msra.mxu1 %v3464_v44  ;;  %v3560_v43 = vld [vmem:[%s5205_s1 + $0x3e4] ss:$8 sps:$4 sm:$0xff]   ;;  %v3555_v44 = vld [vmem:[%s5205_s1 + $0x2e0] ss:$8 sps:$4 sm:$0xff]  }
  0x3f   : > { %2147 = vmatprep.subr.bf16.mxu1 %v3468_v45  ;;  %v3563_v45 = vld [vmem:[%s5205_s1 + $0x2d4] ss:$8 sps:$4 sm:$0xff]  }
  0x41   : > { %2105 = vmatpush2.bf16.msra.mxu0 %v3467_v46  ;;  %v3558_v46 = vld [vmem:[%s5205_s1 + $0x3e0] ss:$8 sps:$4 sm:$0xff]  }
  0x42   : > { %2106 = vmatprep.subr.bf16.mxu0 %v3471_v48  ;;  %2148 = vmatpush2.bf16.msra.mxu1 %v3470_v49  ;;  %v3561_v48 = vld [vmem:[%s5205_s1 + $0x2d0] ss:$8 sps:$4 sm:$0xff]   ;;  %v3569_v49 = vld [vmem:[%s5205_s1 + $0x2c4] ss:$8 sps:$4 sm:$0xff]  }
  0x43   : > { %2149 = vmatprep.subr.bf16.mxu1 %v3474_v50  ;;  %v3564_v50 = vld [vmem:[%s5205_s1 + $0x3d0] ss:$8 sps:$4 sm:$0xff]  }
  0x45   : > { %2107 = vmatpush2.bf16.msra.mxu0 %v3473_v52  ;;  %v3567_v52 = vld [vmem:[%s5205_s1 + $0x2c0] ss:$8 sps:$4 sm:$0xff]  }
  0x46   : > { %2108 = vmatprep.subr.bf16.mxu0 %v3477_v53  ;;  %2150 = vmatpush2.bf16.msra.mxu1 %v3476_v54  ;;  %v3575_v53 = vld [vmem:[%s5205_s1 + $0x2b4] ss:$8 sps:$4 sm:$0xff]   ;;  %v3570_v54 = vld [vmem:[%s5205_s1 + $0x3c0] ss:$8 sps:$4 sm:$0xff]  }
  0x47   : > { %2151 = vmatprep.subr.bf16.mxu1 %v3480_v55  ;;  %v3578_v55 = vld [vmem:[%s5205_s1 + $0x3b4] ss:$8 sps:$4 sm:$0xff]  }
  0x49   : > { %2109 = vmatpush2.bf16.msra.mxu0 %v3479_v56  ;;  %v3573_v56 = vld [vmem:[%s5205_s1 + $0x2b0] ss:$8 sps:$4 sm:$0xff]  }
  0x4a   : > { %2110 = vmatprep.subr.bf16.mxu0 %v3483_v57  ;;  %2152 = vmatpush2.bf16.msra.mxu1 %v3482_v58  ;;  %v3581_v57 = vld [vmem:[%s5205_s1 + $0x2a4] ss:$8 sps:$4 sm:$0xff]   ;;  %v3576_v58 = vld [vmem:[%s5205_s1 + $0x3b0] ss:$8 sps:$4 sm:$0xff]  }
  0x4b   : > { %2153 = vmatprep.subr.bf16.mxu1 %v3486_v59  ;;  %v3584_v59 = vld [vmem:[%s5205_s1 + $0x3a4] ss:$8 sps:$4 sm:$0xff]  }
  0x4d   : > { %2111 = vmatpush2.bf16.msra.mxu0 %v3485_v60  ;;  %v3579_v60 = vld [vmem:[%s5205_s1 + $0x2a0] ss:$8 sps:$4 sm:$0xff]  }
  0x4e   : > { %2112 = vmatprep.subr.bf16.mxu0 %v3489_v61  ;;  %2154 = vmatpush2.bf16.msra.mxu1 %v3488_v62  ;;  %v3587_v61 = vld [vmem:[%s5205_s1 + $0x294] ss:$8 sps:$4 sm:$0xff]   ;;  %v3582_v62 = vld [vmem:[%s5205_s1 + $0x3a0] ss:$8 sps:$4 sm:$0xff]  }
  0x4f   : > { %2155 = vmatprep.subr.bf16.mxu1 %v3492_v63  ;;  %v3590_v63 = vld [vmem:[%s5205_s1 + $0x394] ss:$8 sps:$4 sm:$0xff]  }
  0x51   : > { %2113 = vmatpush2.bf16.msra.mxu0 %v3491_v0  ;;  %v3585_v0 = vld [vmem:[%s5205_s1 + $0x290] ss:$8 sps:$4 sm:$0xff]  }
  0x52   : > { %2168 = vmatprep.subr.bf16.mxu0 %v3500_v1  ;;  %2156 = vmatpush2.bf16.msra.mxu1 %v3497_v2  ;;  %v3593_v1 = vld [vmem:[%s5205_s1 + $0x284] ss:$8 sps:$4 sm:$0xff]   ;;  %v3588_v2 = vld [vmem:[%s5205_s1 + $0x390] ss:$8 sps:$4 sm:$0xff]  }
  0x53   : > { %2211 = vmatprep.subr.bf16.mxu1 %v3506_v4  ;;  %v3591_v4 = vld [vmem:[%s5205_s1 + $0x280] ss:$8 sps:$4 sm:$0xff]  }
  0x54   : > { %2115 = vmatmul.mubr.bf16.vlgmr.msra.gmra.mxu0 %v3494_v3  ;;  %v3596_v3 = vld [vmem:[%s5205_s1 + $0x384] ss:$8 sps:$4 sm:$0xff]  }
  0x55   : > { %2169 = vmatpush1.bf16.msra.mxu0 %v3498_v5  ;;  %2158 = vmatmul.mubr.bf16.vlgmr.msra.gmra.mxu1 %v3501_v6  ;;  %v3602_v5 = vld [vmem:[%s5205_s1 + $0x474] ss:$8 sps:$4 sm:$0xff]   ;;  %v3594_v6 = vld [vmem:[%s5205_s1 + $0x380] ss:$8 sps:$4 sm:$0xff]  }
  0x56   : > { %2170 = vmatprep.subr.bf16.mxu0 %v3509_v7  ;;  %2212 = vmatpush1.bf16.msra.mxu1 %v3504_v8  ;;  %v3597_v7 = vld [vmem:[%s4203_s13 + $0x10] ss:$72 sps:$4 sm:$0xff]   ;;  %v3608_v8 = vld [vmem:[%s5205_s1 + $0x574] ss:$8 sps:$4 sm:$0xff]  }
  0x57   : > { %2213 = vmatprep.subr.bf16.mxu1 %v3512_v9  ;;  %2200 = vmatprep.mubr.bf16.mxu0 %v3599_v33  ;;  %v3600_v9 = vld [vmem:[%s5205_s1 + $0x470] ss:$8 sps:$4 sm:$0xff]   ;;  %v3641_v33 = vld [vmem:[%s5205_s1 + $0x414] ss:$8 sps:$4 sm:$0xff]  }
  0x58   : > { %2243 = vmatprep.mubr.bf16.mxu1 %v3605_v36  ;;  %v3639_v36 = vld [vmem:[%s5205_s1 + $0x410] ss:$8 sps:$4 sm:$0xff]  }
  0x59   : > { %2171 = vmatpush1.bf16.msra.mxu0 %v3507_v10  ;;  %v3603_v10 = vld [vmem:[%s4203_s13 + $0x18] ss:$72 sps:$4 sm:$0xff]  }
  0x5a   : > { %2172 = vmatprep.subr.bf16.mxu0 %v3515_v11  ;;  %2214 = vmatpush1.bf16.msra.mxu1 %v3510_v12  ;;  %v3611_v11 = vld [vmem:[%s5205_s1 + $0x464] ss:$8 sps:$4 sm:$0xff]   ;;  %v3606_v12 = vld [vmem:[%s5205_s1 + $0x570] ss:$8 sps:$4 sm:$0xff]  }
  0x5b   : > { %2215 = vmatprep.subr.bf16.mxu1 %v3518_v13  ;;  %v3614_v13 = vld [vmem:[%s5205_s1 + $0x564] ss:$8 sps:$4 sm:$0xff]  }
  0x5d   : > { %2173 = vmatpush1.bf16.msra.mxu0 %v3513_v14  ;;  %v3609_v14 = vld [vmem:[%s5205_s1 + $0x460] ss:$8 sps:$4 sm:$0xff]  }
  0x5e   : > { %2174 = vmatprep.subr.bf16.mxu0 %v3521_v15  ;;  %2216 = vmatpush1.bf16.msra.mxu1 %v3516_v16  ;;  %v3617_v15 = vld [vmem:[%s5205_s1 + $0x454] ss:$8 sps:$4 sm:$0xff]   ;;  %v3612_v16 = vld [vmem:[%s5205_s1 + $0x560] ss:$8 sps:$4 sm:$0xff]  }
  0x5f   : > { %2217 = vmatprep.subr.bf16.mxu1 %v3524_v17  ;;  %v3620_v17 = vld [vmem:[%s5205_s1 + $0x554] ss:$8 sps:$4 sm:$0xff]  }
  0x61   : > { %2175 = vmatpush1.bf16.msra.mxu0 %v3519_v18  ;;  %v3701_v18 = vld [vmem:[%s4203_s13 + $0x24] ss:$72 sps:$4 sm:$0xff]  }
  0x62   : > { %2176 = vmatprep.subr.bf16.mxu0 %v3527_v19  ;;  %2218 = vmatpush1.bf16.msra.mxu1 %v3522_v20  ;;  %v3615_v19 = vld [vmem:[%s5205_s1 + $0x450] ss:$8 sps:$4 sm:$0xff]  }
  0x63   : > { %2219 = vmatprep.subr.bf16.mxu1 %v3530_v21  ;;  %v3618_v20 = vld [vmem:[%s5205_s1 + $0x550] ss:$8 sps:$4 sm:$0xff]   ;;  %v3623_v21 = vld [vmem:[%s5205_s1 + $0x444] ss:$8 sps:$4 sm:$0xff]  }
  0x65   : > { %2177 = vmatpush1.bf16.msra.mxu0 %v3525_v22  ;;  %v3707_v22 = vld [vmem:[%s4203_s13 + $0x2c] ss:$72 sps:$4 sm:$0xff]  }
  0x66   : > { %2178 = vmatprep.subr.bf16.mxu0 %v3533_v23  ;;  %2220 = vmatpush1.bf16.msra.mxu1 %v3528_v24  ;;  %v3626_v23 = vld [vmem:[%s5205_s1 + $0x544] ss:$8 sps:$4 sm:$0xff]   ;;  %v3621_v24 = vld [vmem:[%s5205_s1 + $0x440] ss:$8 sps:$4 sm:$0xff]  }
  0x67   : > { %2221 = vmatprep.subr.bf16.mxu1 %v3536_v25  ;;  %v3629_v25 = vld [vmem:[%s5205_s1 + $0x434] ss:$8 sps:$4 sm:$0xff]  }
  0x69   : > { %2179 = vmatpush1.bf16.msra.mxu0 %v3531_v26  ;;  %v3624_v26 = vld [vmem:[%s5205_s1 + $0x540] ss:$8 sps:$4 sm:$0xff]  }
  0x6a   : > { %2180 = vmatprep.subr.bf16.mxu0 %v3539_v27  ;;  %2222 = vmatpush1.bf16.msra.mxu1 %v3534_v28  ;;  %v3632_v27 = vld [vmem:[%s5205_s1 + $0x534] ss:$8 sps:$4 sm:$0xff]   ;;  %v3627_v28 = vld [vmem:[%s5205_s1 + $0x430] ss:$8 sps:$4 sm:$0xff]  }
  0x6b   : > { %2223 = vmatprep.subr.bf16.mxu1 %v3542_v29  ;;  %v3635_v29 = vld [vmem:[%s5205_s1 + $0x424] ss:$8 sps:$4 sm:$0xff]  }
  0x6d   : > { %2181 = vmatpush1.bf16.msra.mxu0 %v3537_v30  ;;  %v3630_v30 = vld [vmem:[%s5205_s1 + $0x530] ss:$8 sps:$4 sm:$0xff]  }
  0x6e   : > { %2182 = vmatprep.subr.bf16.mxu0 %v3545_v32  ;;  %2224 = vmatpush1.bf16.msra.mxu1 %v3540_v31  ;;  %v3638_v31 = vld [vmem:[%s5205_s1 + $0x524] ss:$8 sps:$4 sm:$0xff]   ;;  %v3633_v32 = vld [vmem:[%s5205_s1 + $0x420] ss:$8 sps:$4 sm:$0xff]  }
  0x6f   : > { %2225 = vmatprep.subr.bf16.mxu1 %v3548_v34  ;;  %v3636_v34 = vld [vmem:[%s5205_s1 + $0x520] ss:$8 sps:$4 sm:$0xff]  }
  0x71   : > { %2183 = vmatpush1.bf16.msra.mxu0 %v3543_v35  ;;  %v3644_v35 = vld [vmem:[%s5205_s1 + $0x514] ss:$8 sps:$4 sm:$0xff]  }
  0x72   : > { %2184 = vmatprep.subr.bf16.mxu0 %v3551_v37  ;;  %2226 = vmatpush1.bf16.msra.mxu1 %v3546_v38  ;;  %v3647_v37 = vld [vmem:[%s5205_s1 + $0x404] ss:$8 sps:$4 sm:$0xff]   ;;  %v3642_v38 = vld [vmem:[%s5205_s1 + $0x510] ss:$8 sps:$4 sm:$0xff]  }
  0x73   : > { %2227 = vmatprep.subr.bf16.mxu1 %v3554_v39  ;;  %v3650_v39 = vld [vmem:[%s5205_s1 + $0x504] ss:$8 sps:$4 sm:$0xff]  }
  0x75   : > { %2185 = vmatpush2.bf16.msra.mxu0 %v3549_v40  ;;  %v3645_v40 = vld [vmem:[%s5205_s1 + $0x400] ss:$8 sps:$4 sm:$0xff]  }
  0x76   : > { %2186 = vmatprep.subr.bf16.mxu0 %v3557_v41  ;;  %2228 = vmatpush2.bf16.msra.mxu1 %v3552_v42  ;;  %v3653_v41 = vld [vmem:[%s5205_s1 + $0x4f4] ss:$8 sps:$4 sm:$0xff]   ;;  %v3648_v42 = vld [vmem:[%s5205_s1 + $0x500] ss:$8 sps:$4 sm:$0xff]  }
  0x77   : > { %2229 = vmatprep.subr.bf16.mxu1 %v3560_v43  ;;  %v3656_v43 = vld [vmem:[%s5205_s1 + $0x5f4] ss:$8 sps:$4 sm:$0xff]  }
  0x79   : > { %2187 = vmatpush2.bf16.msra.mxu0 %v3555_v44  ;;  %v3651_v44 = vld [vmem:[%s5205_s1 + $0x4f0] ss:$8 sps:$4 sm:$0xff]  }
  0x7a   : > { %2188 = vmatprep.subr.bf16.mxu0 %v3563_v45  ;;  %2230 = vmatpush2.bf16.msra.mxu1 %v3558_v46  ;;  %v3659_v45 = vld [vmem:[%s5205_s1 + $0x4e4] ss:$8 sps:$4 sm:$0xff]   ;;  %v3654_v46 = vld [vmem:[%s5205_s1 + $0x5f0] ss:$8 sps:$4 sm:$0xff]  }
  0x7b   : > { %2231 = vmatprep.subr.bf16.mxu1 %v3566_v47  ;;  %v3662_v47 = vld [vmem:[%s5205_s1 + $0x5e4] ss:$8 sps:$4 sm:$0xff]  }
  0x7d   : > { %2189 = vmatpush2.bf16.msra.mxu0 %v3561_v48  ;;  %v3657_v48 = vld [vmem:[%s5205_s1 + $0x4e0] ss:$8 sps:$4 sm:$0xff]  }
  0x7e   : > { %2190 = vmatprep.subr.bf16.mxu0 %v3569_v49  ;;  %2232 = vmatpush2.bf16.msra.mxu1 %v3564_v50  ;;  %v3665_v49 = vld [vmem:[%s5205_s1 + $0x4d4] ss:$8 sps:$4 sm:$0xff]   ;;  %v3660_v50 = vld [vmem:[%s5205_s1 + $0x5e0] ss:$8 sps:$4 sm:$0xff]  }
  0x7f   : > { %2233 = vmatprep.subr.bf16.mxu1 %v3572_v51  ;;  %v3668_v51 = vld [vmem:[%s5205_s1 + $0x5d4] ss:$8 sps:$4 sm:$0xff]  }
  0x81   : > { %2191 = vmatpush2.bf16.msra.mxu0 %v3567_v52  ;;  %v3663_v52 = vld [vmem:[%s5205_s1 + $0x4d0] ss:$8 sps:$4 sm:$0xff]  }
  0x82   : > { %2192 = vmatprep.subr.bf16.mxu0 %v3575_v53  ;;  %2234 = vmatpush2.bf16.msra.mxu1 %v3570_v54  ;;  %v3671_v53 = vld [vmem:[%s5205_s1 + $0x4c4] ss:$8 sps:$4 sm:$0xff]   ;;  %v3666_v54 = vld [vmem:[%s5205_s1 + $0x5d0] ss:$8 sps:$4 sm:$0xff]  }
  0x83   : > { %2235 = vmatprep.subr.bf16.mxu1 %v3578_v55  ;;  %v579_v55 = vlaneseq }
  0x85   : > { %2193 = vmatpush2.bf16.msra.mxu0 %v3573_v56  ;;  %v3674_v56 = vld [vmem:[%s5205_s1 + $0x5c4] ss:$8 sps:$4 sm:$0xff]  }
  0x86   : > { %2194 = vmatprep.subr.bf16.mxu0 %v3581_v57  ;;  %2236 = vmatpush2.bf16.msra.mxu1 %v3576_v58  ;;  %v3669_v57 = vld [vmem:[%s5205_s1 + $0x4c0] ss:$8 sps:$4 sm:$0xff]   ;;  %v3677_v58 = vld [vmem:[%s5205_s1 + $0x4b4] ss:$8 sps:$4 sm:$0xff]  }
  0x87   : > { %2237 = vmatprep.subr.bf16.mxu1 %v3584_v59  ;;  %v3672_v59 = vld [vmem:[%s5205_s1 + $0x5c0] ss:$8 sps:$4 sm:$0xff]  }
  0x89   : > { %2195 = vmatpush2.bf16.msra.mxu0 %v3579_v60  ;;  %v4615_v60 = vshrl.u32 %v579_v55, 7 }
  0x8a   : > { %2196 = vmatprep.subr.bf16.mxu0 %v3587_v61  ;;  %2238 = vmatpush2.bf16.msra.mxu1 %v3582_v62  ;;  %v3680_v61 = vld [vmem:[%s5205_s1 + $0x5b4] ss:$8 sps:$4 sm:$0xff]   ;;  %v3675_v62 = vld [vmem:[%s5205_s1 + $0x4b0] ss:$8 sps:$4 sm:$0xff]  }
  0x8b   : > { %2239 = vmatprep.subr.bf16.mxu1 %v3590_v63  ;;  %v3683_v63 = vld [vmem:[%s5205_s1 + $0x4a4] ss:$8 sps:$4 sm:$0xff]  }
  0x8d   : > { %2197 = vmatpush2.bf16.msra.mxu0 %v3585_v0  ;;  %v3678_v0 = vld [vmem:[%s5205_s1 + $0x5b0] ss:$8 sps:$4 sm:$0xff]  }
  0x8e   : > { %2198 = vmatprep.subr.bf16.mxu0 %v3593_v1  ;;  %2240 = vmatpush2.bf16.msra.mxu1 %v3588_v2  ;;  %v581_v1 = vsub.s32 0, %v4615_v60  ;;  %v3686_v2 = vld [vmem:[%s5205_s1 + $0x5a4] ss:$8 sps:$4 sm:$0xff]  }
  0x8f   : > { %2241 = vmatprep.subr.bf16.mxu1 %v3596_v3  ;;  %v3681_v3 = vld [vmem:[%s5205_s1 + $0x4a0] ss:$8 sps:$4 sm:$0xff]  }
  0x91   : > { %2199 = vmatpush2.bf16.msra.mxu0 %v3591_v4  ;;  %v3689_v4 = vld [vmem:[%s5205_s1 + $0x494] ss:$8 sps:$4 sm:$0xff]  }
  0x92   : > { %2254 = vmatprep.subr.bf16.mxu0 %v3602_v5  ;;  %2242 = vmatpush2.bf16.msra.mxu1 %v3594_v6  ;;  %v4642_v5 = vld [vmem:[%s5206_s2] sm:$0x3] }
  0x93   : > { %2297 = vmatprep.subr.bf16.mxu1 %v3608_v8  ;;  %v3684_v6 = vld [vmem:[%s5205_s1 + $0x5a0] ss:$8 sps:$4 sm:$0xff]   ;;  %v3692_v8 = vld [vmem:[%s5205_s1 + $0x594] ss:$8 sps:$4 sm:$0xff]  }
  0x94   : > { %2201 = vmatmul.mubr.bf16.vlgmr.msra.gmra.mxu0 %v3597_v7  ;;  %v4648_v7 = vrot.slane %v4642_v5, %v581_v1  ;;  %v3768_v1 = vld [vmem:[%s5205_s1 + $0x7d0] ss:$8 sps:$4 sm:$0xff]  }
  0x95   : > { %2255 = vmatpush1.bf16.msra.mxu0 %v3600_v9  ;;  %2244 = vmatmul.mubr.bf16.vlgmr.msra.gmra.mxu1 %v3603_v10  ;;  %v3687_v9 = vld [vmem:[%s5205_s1 + $0x490] ss:$8 sps:$4 sm:$0xff]   ;;  %v3695_v10 = vld [vmem:[%s5205_s1 + $0x484] ss:$8 sps:$4 sm:$0xff]  }
  0x96   : > { %2256 = vmatprep.subr.bf16.mxu0 %v3611_v11  ;;  %2298 = vmatpush1.bf16.msra.mxu1 %v3606_v12  ;;  %v3690_v11 = vld [vmem:[%s5205_s1 + $0x590] ss:$8 sps:$4 sm:$0xff]   ;;  %v3693_v12 = vld [vmem:[%s5205_s1 + $0x480] ss:$8 sps:$4 sm:$0xff]  }
  0x97   : > { %2299 = vmatprep.subr.bf16.mxu1 %v3614_v13  ;;  %2286 = vmatprep.mubr.bf16.mxu0 %v3701_v18  ;;  %v3698_v13 = vld [vmem:[%s5205_s1 + $0x584] ss:$8 sps:$4 sm:$0xff]   ;;  %v3705_v18 = vld [vmem:[%s4203_s13 + $0x28] ss:$72 sps:$4 sm:$0xff]  }
  0x98   : > { %2329 = vmatprep.mubr.bf16.mxu1 %v3707_v22  ;;  %v3708_v22 = vld [vmem:[%s5205_s1 + $0x770] ss:$8 sps:$4 sm:$0xff]  }
  0x99   : > { %2257 = vmatpush1.bf16.msra.mxu0 %v3609_v14  ;;  %v3696_v14 = vld [vmem:[%s5205_s1 + $0x580] ss:$8 sps:$4 sm:$0xff]  }
  0x9a   : > { %2258 = vmatprep.subr.bf16.mxu0 %v3617_v15  ;;  %2300 = vmatpush1.bf16.msra.mxu1 %v3612_v16  ;;  %v3704_v15 = vld [vmem:[%s5205_s1 + $0x674] ss:$8 sps:$4 sm:$0xff]   ;;  %v3699_v16 = vld [vmem:[%s4203_s13 + $0x20] ss:$72 sps:$4 sm:$0xff]  }
  0x9b   : > { %2301 = vmatprep.subr.bf16.mxu1 %v3620_v17  ;;  %v3702_v17 = vld [vmem:[%s5205_s1 + $0x670] ss:$8 sps:$4 sm:$0xff]  }
  0x9d   : > { %2259 = vmatpush1.bf16.msra.mxu0 %v3615_v19  ;;  %v3710_v19 = vld [vmem:[%s5205_s1 + $0x774] ss:$8 sps:$4 sm:$0xff]  }
  0x9e   : > { %2260 = vmatprep.subr.bf16.mxu0 %v3623_v21  ;;  %2302 = vmatpush1.bf16.msra.mxu1 %v3618_v20  ;;  %v3803_v20 = vld [vmem:[%s4203_s13 + $0x34] ss:$72 sps:$4 sm:$0xff]   ;;  %v3713_v21 = vld [vmem:[%s5205_s1 + $0x664] ss:$8 sps:$4 sm:$0xff]  }
  0x9f   : > { %2303 = vmatprep.subr.bf16.mxu1 %v3626_v23  ;;  %v3809_v23 = vld [vmem:[%s4203_s13 + $0x3c] ss:$72 sps:$4 sm:$0xff]  }
  0xa1   : > { %2261 = vmatpush1.bf16.msra.mxu0 %v3621_v24  ;;  %v3716_v24 = vld [vmem:[%s5205_s1 + $0x764] ss:$8 sps:$4 sm:$0xff]  }
  0xa2   : > { %2262 = vmatprep.subr.bf16.mxu0 %v3629_v25  ;;  %2304 = vmatpush1.bf16.msra.mxu1 %v3624_v26  ;;  %v3711_v25 = vld [vmem:[%s5205_s1 + $0x660] ss:$8 sps:$4 sm:$0xff]   ;;  %v3719_v26 = vld [vmem:[%s5205_s1 + $0x654] ss:$8 sps:$4 sm:$0xff]  }
  0xa3   : > { %2305 = vmatprep.subr.bf16.mxu1 %v3632_v27  ;;  %v3714_v27 = vld [vmem:[%s5205_s1 + $0x760] ss:$8 sps:$4 sm:$0xff]  }
  0xa5   : > { %2263 = vmatpush1.bf16.msra.mxu0 %v3627_v28  ;;  %v3722_v28 = vld [vmem:[%s5205_s1 + $0x754] ss:$8 sps:$4 sm:$0xff]  }
  0xa6   : > { %2264 = vmatprep.subr.bf16.mxu0 %v3635_v29  ;;  %2306 = vmatpush1.bf16.msra.mxu1 %v3630_v30  ;;  %v3717_v29 = vld [vmem:[%s5205_s1 + $0x650] ss:$8 sps:$4 sm:$0xff]   ;;  %v3725_v30 = vld [vmem:[%s5205_s1 + $0x644] ss:$8 sps:$4 sm:$0xff]  }
  0xa7   : > { %2307 = vmatprep.subr.bf16.mxu1 %v3638_v31  ;;  %v3720_v31 = vld [vmem:[%s5205_s1 + $0x750] ss:$8 sps:$4 sm:$0xff]  }
  0xa9   : > { %2265 = vmatpush1.bf16.msra.mxu0 %v3633_v32  ;;  %v3728_v32 = vld [vmem:[%s5205_s1 + $0x744] ss:$8 sps:$4 sm:$0xff]  }
  0xaa   : > { %2266 = vmatprep.subr.bf16.mxu0 %v3641_v33  ;;  %2308 = vmatpush1.bf16.msra.mxu1 %v3636_v34  ;;  %v3723_v33 = vld [vmem:[%s5205_s1 + $0x640] ss:$8 sps:$4 sm:$0xff]   ;;  %v3731_v34 = vld [vmem:[%s5205_s1 + $0x634] ss:$8 sps:$4 sm:$0xff]  }
  0xab   : > { %2309 = vmatprep.subr.bf16.mxu1 %v3644_v35  ;;  %v3726_v35 = vld [vmem:[%s5205_s1 + $0x740] ss:$8 sps:$4 sm:$0xff]  }
  0xad   : > { %2267 = vmatpush1.bf16.msra.mxu0 %v3639_v36  ;;  %v3734_v36 = vld [vmem:[%s5205_s1 + $0x734] ss:$8 sps:$4 sm:$0xff]  }
  0xae   : > { %2268 = vmatprep.subr.bf16.mxu0 %v3647_v37  ;;  %2310 = vmatpush1.bf16.msra.mxu1 %v3642_v38  ;;  %v3729_v37 = vld [vmem:[%s5205_s1 + $0x630] ss:$8 sps:$4 sm:$0xff]   ;;  %v3737_v38 = vld [vmem:[%s5205_s1 + $0x624] ss:$8 sps:$4 sm:$0xff]  }
  0xaf   : > { %2311 = vmatprep.subr.bf16.mxu1 %v3650_v39  ;;  %v3732_v39 = vld [vmem:[%s5205_s1 + $0x730] ss:$8 sps:$4 sm:$0xff]  }
  0xb1   : > { %2269 = vmatpush1.bf16.msra.mxu0 %v3645_v40  ;;  %v3740_v40 = vld [vmem:[%s5205_s1 + $0x724] ss:$8 sps:$4 sm:$0xff]  }
  0xb2   : > { %2270 = vmatprep.subr.bf16.mxu0 %v3653_v41  ;;  %2312 = vmatpush1.bf16.msra.mxu1 %v3648_v42  ;;  %v3735_v41 = vld [vmem:[%s5205_s1 + $0x620] ss:$8 sps:$4 sm:$0xff]   ;;  %v3743_v42 = vld [vmem:[%s5205_s1 + $0x614] ss:$8 sps:$4 sm:$0xff]  }
  0xb3   : > { %2313 = vmatprep.subr.bf16.mxu1 %v3656_v43  ;;  %v3738_v43 = vld [vmem:[%s5205_s1 + $0x720] ss:$8 sps:$4 sm:$0xff]  }
  0xb5   : > { %2271 = vmatpush2.bf16.msra.mxu0 %v3651_v44  ;;  %v3746_v44 = vld [vmem:[%s5205_s1 + $0x714] ss:$8 sps:$4 sm:$0xff]  }
  0xb6   : > { %2272 = vmatprep.subr.bf16.mxu0 %v3659_v45  ;;  %2314 = vmatpush2.bf16.msra.mxu1 %v3654_v46  ;;  %v3741_v45 = vld [vmem:[%s5205_s1 + $0x610] ss:$8 sps:$4 sm:$0xff]   ;;  %v3749_v46 = vld [vmem:[%s5205_s1 + $0x604] ss:$8 sps:$4 sm:$0xff]  }
  0xb7   : > { %2315 = vmatprep.subr.bf16.mxu1 %v3662_v47  ;;  %v3744_v47 = vld [vmem:[%s5205_s1 + $0x710] ss:$8 sps:$4 sm:$0xff]  }
  0xb9   : > { %2273 = vmatpush2.bf16.msra.mxu0 %v3657_v48  ;;  %v3752_v48 = vld [vmem:[%s5205_s1 + $0x704] ss:$8 sps:$4 sm:$0xff]  }
  0xba   : > { %2274 = vmatprep.subr.bf16.mxu0 %v3665_v49  ;;  %2316 = vmatpush2.bf16.msra.mxu1 %v3660_v50  ;;  %v3747_v49 = vld [vmem:[%s5205_s1 + $0x600] ss:$8 sps:$4 sm:$0xff]   ;;  %v3755_v50 = vld [vmem:[%s5205_s1 + $0x6f4] ss:$8 sps:$4 sm:$0xff]  }
  0xbb   : > { %2317 = vmatprep.subr.bf16.mxu1 %v3668_v51  ;;  %v3750_v51 = vld [vmem:[%s5205_s1 + $0x700] ss:$8 sps:$4 sm:$0xff]  }
  0xbd   : > { %2275 = vmatpush2.bf16.msra.mxu0 %v3663_v52  ;;  %v3758_v52 = vld [vmem:[%s5205_s1 + $0x7f4] ss:$8 sps:$4 sm:$0xff]  }
  0xbe   : > { %2276 = vmatprep.subr.bf16.mxu0 %v3671_v53  ;;  %2318 = vmatpush2.bf16.msra.mxu1 %v3666_v54  ;;  %v3753_v53 = vld [vmem:[%s5205_s1 + $0x6f0] ss:$8 sps:$4 sm:$0xff]   ;;  %v3761_v54 = vld [vmem:[%s5205_s1 + $0x6e4] ss:$8 sps:$4 sm:$0xff]  }
  0xbf   : > { %2319 = vmatprep.subr.bf16.mxu1 %v3674_v56  ;;  %v3756_v56 = vld [vmem:[%s5205_s1 + $0x7f0] ss:$8 sps:$4 sm:$0xff]  }
  0xc1   : > { %2277 = vmatpush2.bf16.msra.mxu0 %v3669_v57  ;;  %v3764_v57 = vld [vmem:[%s5205_s1 + $0x7e4] ss:$8 sps:$4 sm:$0xff]  }
  0xc2   : > { %2278 = vmatprep.subr.bf16.mxu0 %v3677_v58  ;;  %2320 = vmatpush2.bf16.msra.mxu1 %v3672_v59  ;;  %v3759_v58 = vld [vmem:[%s5205_s1 + $0x6e0] ss:$8 sps:$4 sm:$0xff]   ;;  %v3767_v59 = vld [vmem:[%s5205_s1 + $0x6d4] ss:$8 sps:$4 sm:$0xff]  }
  0xc3   : > { %2321 = vmatprep.subr.bf16.mxu1 %v3680_v61  ;;  %v3762_v61 = vld [vmem:[%s5205_s1 + $0x7e0] ss:$8 sps:$4 sm:$0xff]  }
  0xc5   : > { %2279 = vmatpush2.bf16.msra.mxu0 %v3675_v62  ;;  %v3770_v62 = vld [vmem:[%s5205_s1 + $0x7d4] ss:$8 sps:$4 sm:$0xff]  }
  0xc6   : > { %2280 = vmatprep.subr.bf16.mxu0 %v3683_v63  ;;  %2322 = vmatpush2.bf16.msra.mxu1 %v3678_v0  ;;  %v3765_v63 = vld [vmem:[%s5205_s1 + $0x6d0] ss:$8 sps:$4 sm:$0xff]   ;;  %v3773_v0 = vld [vmem:[%s5205_s1 + $0x6c4] ss:$8 sps:$4 sm:$0xff]  }
  0xc7   : > { %2323 = vmatprep.subr.bf16.mxu1 %v3686_v2  ;;  %v3776_v2 = vld [vmem:[%s5205_s1 + $0x7c4] ss:$8 sps:$4 sm:$0xff]  }
  0xc9   : > { %2281 = vmatpush2.bf16.msra.mxu0 %v3681_v3  ;;  %v3771_v3 = vld [vmem:[%s5205_s1 + $0x6c0] ss:$8 sps:$4 sm:$0xff]  }
  0xca   : > { %2282 = vmatprep.subr.bf16.mxu0 %v3689_v4  ;;  %2324 = vmatpush2.bf16.msra.mxu1 %v3684_v6  ;;  %v3779_v4 = vld [vmem:[%s5205_s1 + $0x6b4] ss:$8 sps:$4 sm:$0xff]   ;;  %v3774_v6 = vld [vmem:[%s5205_s1 + $0x7c0] ss:$8 sps:$4 sm:$0xff]  }
  0xcb   : > { %2325 = vmatprep.subr.bf16.mxu1 %v3692_v8  ;;  %v3782_v8 = vld [vmem:[%s5205_s1 + $0x7b4] ss:$8 sps:$4 sm:$0xff]  }
  0xcd   : > { %2283 = vmatpush2.bf16.msra.mxu0 %v3687_v9  ;;  %v3777_v9 = vld [vmem:[%s5205_s1 + $0x6b0] ss:$8 sps:$4 sm:$0xff]  }
  0xce   : > { %2284 = vmatprep.subr.bf16.mxu0 %v3695_v10  ;;  %2326 = vmatpush2.bf16.msra.mxu1 %v3690_v11  ;;  %v3785_v10 = vld [vmem:[%s5205_s1 + $0x6a4] ss:$8 sps:$4 sm:$0xff]   ;;  %v3780_v11 = vld [vmem:[%s5205_s1 + $0x7b0] ss:$8 sps:$4 sm:$0xff]  }
  0xcf   : > { %2327 = vmatprep.subr.bf16.mxu1 %v3698_v13  ;;  %v3783_v13 = vld [vmem:[%s5205_s1 + $0x6a0] ss:$8 sps:$4 sm:$0xff]  }
  0xd1   : > { %2285 = vmatpush2.bf16.msra.mxu0 %v3693_v12  ;;  %v3788_v12 = vld [vmem:[%s5205_s1 + $0x7a4] ss:$8 sps:$4 sm:$0xff]  }
  0xd2   : > { %2340 = vmatprep.subr.bf16.mxu0 %v3704_v15  ;;  %2328 = vmatpush2.bf16.msra.mxu1 %v3696_v14  ;;  %v3791_v14 = vld [vmem:[%s5205_s1 + $0x694] ss:$8 sps:$4 sm:$0xff]   ;;  %v3786_v15 = vld [vmem:[%s5205_s1 + $0x7a0] ss:$8 sps:$4 sm:$0xff]  }
  0xd3   : > { %2383 = vmatprep.subr.bf16.mxu1 %v3710_v19  ;;  %v3792_v19 = vld [vmem:[%s5205_s1 + $0x790] ss:$8 sps:$4 sm:$0xff]  }
  0xd4   : > { %2287 = vmatmul.mubr.bf16.vlgmr.msra.gmra.mxu0 %v3699_v16  ;;  %v3794_v16 = vld [vmem:[%s5205_s1 + $0x794] ss:$8 sps:$4 sm:$0xff]  }
  0xd5   : > { %2341 = vmatpush1.bf16.msra.mxu0 %v3702_v17  ;;  %2372 = vmatprep.mubr.bf16.mxu0 %v3803_v20  ;;  %v3789_v17 = vld [vmem:[%s5205_s1 + $0x690] ss:$8 sps:$4 sm:$0xff]   ;;  %v3800_v20 = vld [vmem:[%s5205_s1 + $0x784] ss:$8 sps:$4 sm:$0xff]  }
  0xd6   : > { %2330 = vmatmul.mubr.bf16.vlgmr.msra.gmra.mxu1 %v3705_v18  ;;  %2342 = vmatprep.subr.bf16.mxu0 %v3713_v21  ;;  %v3797_v18 = vld [vmem:[%s5205_s1 + $0x684] ss:$8 sps:$4 sm:$0xff]   ;;  %v3795_v21 = vld [vmem:[%s5205_s1 + $0x680] ss:$8 sps:$4 sm:$0xff]  }
  0xd7   : > { %2384 = vmatpush1.bf16.msra.mxu1 %v3708_v22  ;;  %2415 = vmatprep.mubr.bf16.mxu1 %v3809_v23  ;;  %v3806_v22 = vld [vmem:[%s5205_s1 + $0x874] ss:$8 sps:$4 sm:$0xff]   ;;  %v3798_v23 = vld [vmem:[%s5205_s1 + $0x780] ss:$8 sps:$4 sm:$0xff]  }
  0xd8   : > { %2385 = vmatprep.subr.bf16.mxu1 %v3716_v24  ;;  %v3801_v24 = vld [vmem:[%s4203_s13 + $0x30] ss:$72 sps:$4 sm:$0xff]  }
  0xd9   : > { %2343 = vmatpush1.bf16.msra.mxu0 %v3711_v25  ;;  %v3804_v25 = vld [vmem:[%s5205_s1 + $0x870] ss:$8 sps:$4 sm:$0xff]  }
  0xda   : > { %2344 = vmatprep.subr.bf16.mxu0 %v3719_v26  ;;  %v3843_v26 = vld [vmem:[%s4203_s13 + $0x44] ss:$72 sps:$4 sm:$0xff]  }
  0xdb   : > { %2386 = vmatpush1.bf16.msra.mxu1 %v3714_v27  ;;  %v3807_v27 = vld [vmem:[%s4203_s13 + $0x38] ss:$72 sps:$4 sm:$0xff]  }
  0xdc   : > { %2387 = vmatprep.subr.bf16.mxu1 %v3722_v28  ;;  %v3812_v28 = vld [vmem:[%s5205_s1 + $0x864] ss:$8 sps:$4 sm:$0xff]  }
  0xdd   : > { %2345 = vmatpush1.bf16.msra.mxu0 %v3717_v29 }
  0xde   : > { %2346 = vmatprep.subr.bf16.mxu0 %v3725_v30 }
  0xdf   : > { %2388 = vmatpush1.bf16.msra.mxu1 %v3720_v31  ;;  %v3810_v31 = vld [vmem:[%s5205_s1 + $0x860] ss:$8 sps:$4 sm:$0xff]  }
  0xe0   : > { %2389 = vmatprep.subr.bf16.mxu1 %v3728_v32 }
  0xe1   : > { %2347 = vmatpush1.bf16.msra.mxu0 %v3723_v33 }
  0xe2   : > { %2348 = vmatprep.subr.bf16.mxu0 %v3731_v34  ;;  %v3815_v34 = vld [vmem:[%s5205_s1 + $0x854] ss:$8 sps:$4 sm:$0xff]  }
  0xe3   : > { %2390 = vmatpush1.bf16.msra.mxu1 %v3726_v35 }
  0xe4   : > { %2391 = vmatprep.subr.bf16.mxu1 %v3734_v36 }
  0xe5   : > { %2349 = vmatpush1.bf16.msra.mxu0 %v3729_v37 }
  0xe6   : > { %2350 = vmatprep.subr.bf16.mxu0 %v3737_v38 }
  0xe7   : > { %2392 = vmatpush1.bf16.msra.mxu1 %v3732_v39  ;;  %v3813_v39 = vld [vmem:[%s5205_s1 + $0x850] ss:$8 sps:$4 sm:$0xff]  }
  0xe8   : > { %2393 = vmatprep.subr.bf16.mxu1 %v3740_v40 }
  0xe9   : > { %2351 = vmatpush1.bf16.msra.mxu0 %v3735_v41  ;;  %v3818_v41 = vld [vmem:[%s5205_s1 + $0x844] ss:$8 sps:$4 sm:$0xff]  }
  0xea   : > { %2352 = vmatprep.subr.bf16.mxu0 %v3743_v42 }
  0xeb   : > { %2394 = vmatpush1.bf16.msra.mxu1 %v3738_v43  ;;  %v3816_v43 = vld [vmem:[%s5205_s1 + $0x840] ss:$8 sps:$4 sm:$0xff]  }
  0xec   : > { %2395 = vmatprep.subr.bf16.mxu1 %v3746_v44  ;;  %v3821_v44 = vld [vmem:[%s5205_s1 + $0x834] ss:$8 sps:$4 sm:$0xff]  }
  0xed   : > { %2353 = vmatpush1.bf16.msra.mxu0 %v3741_v45  ;;  %v3819_v45 = vld [vmem:[%s5205_s1 + $0x830] ss:$8 sps:$4 sm:$0xff]  }
  0xee   : > { %2354 = vmatprep.subr.bf16.mxu0 %v3749_v46  ;;  %v3824_v46 = vld [vmem:[%s5205_s1 + $0x824] ss:$8 sps:$4 sm:$0xff]  }
  0xef   : > { %2396 = vmatpush1.bf16.msra.mxu1 %v3744_v47  ;;  %v3822_v47 = vld [vmem:[%s5205_s1 + $0x820] ss:$8 sps:$4 sm:$0xff]  }
  0xf0   : > { %2397 = vmatprep.subr.bf16.mxu1 %v3752_v48  ;;  %v3827_v48 = vld [vmem:[%s5205_s1 + $0x814] ss:$8 sps:$4 sm:$0xff]  }
  0xf1   : > { %2355 = vmatpush1.bf16.msra.mxu0 %v3747_v49  ;;  %v3825_v49 = vld [vmem:[%s5205_s1 + $0x810] ss:$8 sps:$4 sm:$0xff]  }
  0xf2   : > { %2356 = vmatprep.subr.bf16.mxu0 %v3755_v50  ;;  %v3830_v50 = vld [vmem:[%s5205_s1 + $0x804] ss:$8 sps:$4 sm:$0xff]  }
  0xf3   : > { %2398 = vmatpush1.bf16.msra.mxu1 %v3750_v51  ;;  %v3828_v51 = vld [vmem:[%s5205_s1 + $0x800] ss:$8 sps:$4 sm:$0xff]  }
  0xf4   : > { %2399 = vmatprep.subr.bf16.mxu1 %v3758_v52  ;;  %v3833_v52 = vld [vmem:[%s5205_s1 + $0x8b4] ss:$8 sps:$4 sm:$0xff]  }
  0xf5   : > { %2357 = vmatpush2.bf16.msra.mxu0 %v3753_v53  ;;  %v3831_v53 = vld [vmem:[%s5205_s1 + $0x8b0] ss:$8 sps:$4 sm:$0xff]  }
  0xf6   : > { %2358 = vmatprep.subr.bf16.mxu0 %v3761_v54  ;;  %v3836_v54 = vld [vmem:[%s5205_s1 + $0x8a4] ss:$8 sps:$4 sm:$0xff]  }
  0xf7   : > { %2400 = vmatpush2.bf16.msra.mxu1 %v3756_v56  ;;  %v3834_v56 = vld [vmem:[%s5205_s1 + $0x8a0] ss:$8 sps:$4 sm:$0xff]  }
  0xf8   : > { %2401 = vmatprep.subr.bf16.mxu1 %v3764_v57  ;;  %v3839_v57 = vld [vmem:[%s5205_s1 + $0x894] ss:$8 sps:$4 sm:$0xff]  }
  0xf9   : > { %2359 = vmatpush2.bf16.msra.mxu0 %v3759_v58  ;;  %v3837_v58 = vld [vmem:[%s5205_s1 + $0x890] ss:$8 sps:$4 sm:$0xff]  }
  0xfa   : > { %2360 = vmatprep.subr.bf16.mxu0 %v3767_v59  ;;  %v3842_v59 = vld [vmem:[%s5205_s1 + $0x884] ss:$8 sps:$4 sm:$0xff]  }
  0xfb   : > { %2402 = vmatpush2.bf16.msra.mxu1 %v3762_v61  ;;  %v3840_v61 = vld [vmem:[%s5205_s1 + $0x880] ss:$8 sps:$4 sm:$0xff]  }
  0xfc   : > { %2403 = vmatprep.subr.bf16.mxu1 %v3770_v62  ;;  %v3845_v62 = vld [vmem:[%s4203_s13 + $0x40] ss:$72 sps:$4 sm:$0xff]   ;;  %s3005_s13 = sshll.u32 %s261_s12, 4 }
  0xfd   : > { %2361 = vmatpush2.bf16.msra.mxu0 %v3765_v63 }
  0xfe   : > { %2362 = vmatprep.subr.bf16.mxu0 %v3773_v0 }
  0xff   : > { %2404 = vmatpush2.bf16.msra.mxu1 %v3768_v1 }
 0x100   : > { %2405 = vmatprep.subr.bf16.mxu1 %v3776_v2 }
 0x101   : > { %2363 = vmatpush2.bf16.msra.mxu0 %v3771_v3 }
 0x102   : > { %2364 = vmatprep.subr.bf16.mxu0 %v3779_v4 }
 0x103   : > { %2406 = vmatpush2.bf16.msra.mxu1 %v3774_v6 }
 0x104   : > { %2407 = vmatprep.subr.bf16.mxu1 %v3782_v8 }
 0x105   : > { %2365 = vmatpush2.bf16.msra.mxu0 %v3777_v9 }
 0x106   : > { %2366 = vmatprep.subr.bf16.mxu0 %v3785_v10 }
 0x107   : > { %2408 = vmatpush2.bf16.msra.mxu1 %v3780_v11 }
 0x108   : > { %2409 = vmatprep.subr.bf16.mxu1 %v3788_v12 }
 0x109   : > { %2367 = vmatpush2.bf16.msra.mxu0 %v3783_v13  ;;  %v2579_v13 = vld [vmem:[%s5208_s4 + $0x38] sm:$0xff] }
 0x10a   : > { %2368 = vmatprep.subr.bf16.mxu0 %v3791_v14  ;;  %v2578_v14 = vld [vmem:[%s5208_s4 + $0x30] sm:$0xff] }
 0x10b   : > { %2410 = vmatpush2.bf16.msra.mxu1 %v3786_v15  ;;  %v2577_v15 = vld [vmem:[%s5208_s4 + $0x28] sm:$0xff] }
 0x10c   : > { %2411 = vmatprep.subr.bf16.mxu1 %v3794_v16  ;;  %v2576_v16 = vld [vmem:[%s5208_s4 + $0x20] sm:$0xff] }
 0x10d   : > { %2369 = vmatpush2.bf16.msra.mxu0 %v3789_v17  ;;  %v2575_v17 = vld [vmem:[%s5208_s4 + $0x18] sm:$0xff] }
 0x10e   : > { %2370 = vmatprep.subr.bf16.mxu0 %v3797_v18  ;;  %v2574_v18 = vld [vmem:[%s5208_s4 + $0x10] sm:$0xff] }
 0x10f   : > { %2412 = vmatpush2.bf16.msra.mxu1 %v3792_v19  ;;  %v2573_v19 = vld [vmem:[%s5208_s4 + $0x8] sm:$0xff] }
 0x110   : > { %2413 = vmatprep.subr.bf16.mxu1 %v3800_v20  ;;  %v2572_v20 = vld [vmem:[%s5208_s4] sm:$0xff] }
 0x111   : > { %2371 = vmatpush2.bf16.msra.mxu0 %v3795_v21 }
 0x112   : > { %2426 = vmatprep.subr.bf16.mxu0 %v3806_v22 }
 0x113   : > { %2414 = vmatpush2.bf16.msra.mxu1 %v3798_v23 }
 0x114   : > { %v2116_v29 = vpop.f32.mrf.mxu0  ;;  %2373 = vmatmul.mubr.bf16.vlgmr.msra.gmra.mxu0 %v3801_v24  ;;  %3328 = vmatprep.subr.mxu1 %v2579_v13 }
 0x115   : > { %v2117_v30 = vadd.f32 %v2116_v29, %v4648_v7  ;;  %2427 = vmatpush1.bf16.msra.mxu0 %v3804_v25  ;;  %3308 = vmatprep.mubr.msk.bf16.mxu0 %vm2078_vm0, %v3843_v26  ;;  %v2159_v33 = vpop.f32.mrf.mxu1 }
 0x116   : > { %v4884_v32 = vpop.f32.mrf.mxu0  ;;  %2416 = vmatmul.mubr.bf16.vlgmr.msra.gmra.mxu1 %v3807_v27  ;;  %2428 = vmatprep.subr.bf16.mxu0 %v3812_v28 }
 0x117   : > { %v2160_v35 = vadd.f32 %v2159_v33, %v2117_v30  ;;  %v4889_v37 = vpop.f32.mrf.mxu1  ;;  %3329 = vmatpush3.msra.mxu1 %v2579_v13 }
 0x118   : > { %v2120_v36 = vpop.f32.mrf.mxu0  ;;  %3330 = vmatprep.subr.mxu1 %v2578_v14 }
 0x119   : > { %v2121_v38 = vadd.f32 %v2120_v36, %v4648_v7  ;;  %2429 = vmatpush1.bf16.msra.mxu0 %v3810_v31  ;;  %v2163_v40 = vpop.f32.mrf.mxu1  ;;  %v3309_v7 = vld [vmem:[%s5207_s3] ss:$0 sm:$0xff]  ;;  %3331 = vmatpush3.msra.mxu1 %v2578_v14 }
 0x11a   : > { %2430 = vmatprep.subr.bf16.mxu0 %v3815_v34  ;;  %2503 = vrot.lane.b32.xlu0 %v3309_v7, %s3968_s19  ;;  %v4954_v63 = vpop.f32.mrf.mxu0 }
 0x11b   : > { %v2164_v42 = vadd.f32 %v2163_v40, %v2121_v38  ;;  %v4956_v0 = vpop.f32.mrf.mxu1  ;;  %3332 = vmatprep.subr.mxu1 %v2577_v15 }
 0x11c   : > { %3333 = vmatpush3.msra.mxu1 %v2577_v15 }
 0x11d   : > { %2431 = vmatpush1.bf16.msra.mxu0 %v3813_v39  ;;  %3334 = vmatprep.subr.mxu1 %v2576_v16 }
 0x11e   : > { %2432 = vmatprep.subr.bf16.mxu0 %v3818_v41  ;;  %3335 = vmatpush3.msra.mxu1 %v2576_v16 }
 0x11f   : > { %3336 = vmatprep.subr.mxu1 %v2575_v17 }
 0x120   : > { %3337 = vmatpush3.msra.mxu1 %v2575_v17 }
 0x121   : > { %2433 = vmatpush1.bf16.msra.mxu0 %v3816_v43  ;;  %3338 = vmatprep.subr.mxu1 %v2574_v18 }
 0x122   : > { %2434 = vmatprep.subr.bf16.mxu0 %v3821_v44  ;;  %3339 = vmatpush3.msra.mxu1 %v2574_v18 }
 0x123   : > { %3340 = vmatprep.subr.mxu1 %v2573_v19 }
 0x124   : > { %3341 = vmatpush3.msra.mxu1 %v2573_v19 }
 0x125   : > { %2435 = vmatpush1.bf16.msra.mxu0 %v3819_v45  ;;  %3342 = vmatprep.subr.mxu1 %v2572_v20 }
 0x126   : > { %2436 = vmatprep.subr.bf16.mxu0 %v3824_v46  ;;  %3343 = vmatpush3.msra.mxu1 %v2572_v20  ;;  %v585_v46 = vsub.s32 1, %v4615_v60 }
 0x129   : > { %2437 = vmatpush1.bf16.msra.mxu0 %v3822_v47  ;;  %v586_v47 = vrot.slane %v4642_v5, %v585_v46 }
 0x12a   : > { %2438 = vmatprep.subr.bf16.mxu0 %v3827_v48 }
 0x12b   : > { %v2119_v48 = vadd.f32 %v4884_v32, %v586_v47 }
 0x12d   : > { %2439 = vmatpush1.bf16.msra.mxu0 %v3825_v49  ;;  %v2162_v49 = vadd.f32 %v4889_v37, %v2119_v48 }
 0x12e   : > { %2440 = vmatprep.subr.bf16.mxu0 %v3830_v50  ;;  %v2123_v50 = vadd.f32 %v4954_v63, %v586_v47 }
 0x131   : > { %2441 = vmatpush1.bf16.msra.mxu0 %v3828_v51 }
 0x132   : > { %2450 = vmatprep.subr.bf16.mxu0 %v3833_v52  ;;  %v2166_v52 = vadd.f32 %v4956_v0, %v2123_v50 }
 0x135   : > { %2451 = vmatpush2.bf16.msra.mxu0 %v3831_v53 }
 0x136   : > { %2452 = vmatprep.subr.bf16.mxu0 %v3836_v54 }
 0x139   : > { %2453 = vmatpush2.bf16.msra.mxu0 %v3834_v56 }
 0x13a   : > { %2454 = vmatprep.subr.bf16.mxu0 %v3839_v57 }
 0x13d   : > { %2455 = vmatpush2.bf16.msra.mxu0 %v3837_v58 }
 0x13e   : > { %2456 = vmatprep.subr.bf16.mxu0 %v3842_v59 }
 0x141   : > { %2457 = vmatpush2.bf16.msra.mxu0 %v3840_v61 }
 0x144   : > { %2459 = vmatmul.mubr.bf16.vlgmr.msra.gmra.mxu0 %v3845_v62 }
 0x154   : > { %v2202_v1 = vpop.f32.mrf.mxu0 }
 0x155   : > { %v2203_v2 = vadd.f32 %v2202_v1, %v2160_v35  ;;  %v2245_v4 = vpop.f32.mrf.mxu1 }
 0x156   : > { %v2204_v3 = vpop.f32.mrf.mxu0 }
 0x157   : > { %v2246_v6 = vadd.f32 %v2245_v4, %v2203_v2  ;;  %v2247_v9 = vpop.f32.mrf.mxu1  ;;  %v2205_v51 = vadd.f32 %v2204_v3, %v2162_v49 }
 0x158   : > { %v2206_v8 = vpop.f32.mrf.mxu0 }
 0x159   : > { %v2207_v10 = vadd.f32 %v2206_v8, %v2164_v42  ;;  %v2249_v11 = vpop.f32.mrf.mxu1  ;;  %v2248_v53 = vadd.f32 %v2247_v9, %v2205_v51 }
 0x15a   : > { %v2208_v21 = vpop.f32.mrf.mxu0 }
 0x15b   : > { %v2250_v12 = vadd.f32 %v2249_v11, %v2207_v10  ;;  %v2251_v22 = vpop.f32.mrf.mxu1  ;;  %v2209_v54 = vadd.f32 %v2208_v21, %v2166_v52 }
 0x15d   : > { %v2252_v57 = vadd.f32 %v2251_v22, %v2209_v54 }
 0x194   : > { %v2288_v23 = vpop.f32.mrf.mxu0 }
 0x195   : > { %v2289_v24 = vadd.f32 %v2288_v23, %v2246_v6 }
 0x196   : > { %v2290_v25 = vpop.f32.mrf.mxu0  ;;  %v2331_v26 = vpop.f32.mrf.mxu1 }
 0x197   : > { %v2332_v27 = vadd.f32 %v2331_v26, %v2289_v24  ;;  %v2291_v56 = vadd.f32 %v2290_v25, %v2248_v53 }
 0x198   : > { %v2292_v28 = vpop.f32.mrf.mxu0  ;;  %v2333_v29 = vpop.f32.mrf.mxu1 }
 0x199   : > { %v2293_v30 = vadd.f32 %v2292_v28, %v2250_v12  ;;  %v2334_v58 = vadd.f32 %v2333_v29, %v2291_v56 }
 0x19a   : > { %v2335_v31 = vpop.f32.mrf.mxu1  ;;  %v2294_v34 = vpop.f32.mrf.mxu0 }
 0x19b   : > { %v2336_v33 = vadd.f32 %v2335_v31, %v2293_v30  ;;  %v2295_v59 = vadd.f32 %v2294_v34, %v2252_v57  ;;  %v2504_v30 = vpop.permute.xlu0 %2503  ;;  %v5013_v34 = vand.u32 127, %v579_v55 }
 0x19c   : > { %v2337_v35 = vpop.f32.mrf.mxu1 }
 0x19d   : > { %v2338_v60 = vadd.f32 %v2337_v35, %v2295_v59  ;;  %vm2663_vm3 = vcmp.lt.s32.totalorder %v5013_v34, 5  ;;  %vm2697_vm5 = vcmp.lt.s32.totalorder %v5013_v34, 10  ;;  %vm2738_vm6 = vcmp.lt.s32.totalorder %v5013_v34, 7 }
 0x19e   : > { %vm2777_vm7 = vcmp.lt.s32.totalorder %v5013_v34, 4 }
 0x1d4   : > { %v2374_v36 = vpop.f32.mrf.mxu0 }
 0x1d5   : > { %v2375_v38 = vadd.f32 %v2374_v36, %v2332_v27 }
 0x1d6   : > { %v2376_v39 = vpop.f32.mrf.mxu0  ;;  %v2417_v40 = vpop.f32.mrf.mxu1 }
 0x1d7   : > { %v2418_v41 = vadd.f32 %v2417_v40, %v2375_v38  ;;  %v2377_v61 = vadd.f32 %v2376_v39, %v2334_v58 }
 0x1d8   : > { %v2378_v42 = vpop.f32.mrf.mxu0  ;;  %v2419_v43 = vpop.f32.mrf.mxu1 }
 0x1d9   : > { %v2379_v7 = vadd.f32 %v2378_v42, %v2336_v33  ;;  %v2420_v5 = vadd.f32 %v2419_v43, %v2377_v61 }
 0x1da   : > { %v2421_v44 = vpop.f32.mrf.mxu1  ;;  %v2380_v62 = vpop.f32.mrf.mxu0 }
 0x1db   : > { %v2422_v45 = vadd.f32 %v2421_v44, %v2379_v7  ;;  %v2381_v2 = vadd.f32 %v2380_v62, %v2338_v60 }
 0x1dc   : > { %v2423_v4 = vpop.f32.mrf.mxu1 }
 0x1dd   : > { %v2424_v0 = vadd.f32 %v2423_v4, %v2381_v2 }
 0x204   : > { %v2460_v1 = vpop.f32.mrf.mxu0 }
 0x205   : > { %v2461_v32 = vadd.f32 %v2460_v1, %v2418_v41 }
 0x206   : > { %v2462_v37 = vpop.f32.mrf.mxu0 }
 0x207   : > { %3846 = vtanh.f32 %v2461_v32  ;;  %v4988_v63 = vadd.f32 %v2462_v37, %v2420_v5  ;;  %v2485_v16 = vsub.f32 0.0, %v2461_v32 }
 0x208   : > { %v2464_v3 = vpop.f32.mrf.mxu0 }
 0x209   : > { %v2465_v6 = vadd.f32 %v2464_v3, %v2422_v45  ;;  %3344 = vmatprep.mubr.msk.f32.mxu1 %vm2078_vm0, %v4988_v63  ;;  %v2487_v18 = vmul.f32 1.442695, %v2485_v16 }
 0x20a   : > { %v2466_v8 = vpop.f32.mrf.mxu0 }
 0x20b   : > { %v4992_v9 = vadd.f32 %v2466_v8, %v2424_v0  ;;  %3848 = vtanh.f32 %v2465_v6  ;;  %v2486_v17 = vsub.f32 0.0, %v2465_v6 }
 0x20c   : > { %3850 = vpow2.f32 %v2487_v18 }
 0x20d   : > { %3345 = vmatmul.mubr.msk.f32.vlgmr.msra.gmra.mxu1 %vm2078_vm0, %v4992_v9  ;;  %v2489_v19 = vmul.f32 1.442695, %v2486_v17 }
 0x20f   : > { %3852 = vpow2.f32 %v2489_v19 }
 0x214   : > { %v4996_v10 = vpop.eup %3846 }
 0x215   : > { %v2879_v11 = vsel %vm2878_vm1, %v2461_v32, %v4996_v10 }
 0x216   : > { %v5000_v12 = vsel %vm2881_vm2, %v2879_v11, %v4996_v10 }
 0x218   : > { %v5002_v13 = vpop.eup %3848 }
 0x219   : > { %v2880_v14 = vsel %vm2878_vm1, %v2465_v6, %v5002_v13  ;;  %v3851_v20 = vpop.eup %3850  ;;  %vm2905_vm1 = vcmask 883712  }
 0x21a   : > { %v5006_v15 = vsel %vm2881_vm2, %v2880_v14, %v5002_v13  ;;  %v2491_v22 = vadd.f32 1.0, %v3851_v20  ;;  %vm2908_vm2 = vcmask 965632  }
 0x21c   : > { %v3853_v21 = vpop.eup %3852  ;;  %3854 = vrcp.f32 %v2491_v22 }
 0x21d   : > { %v2492_v23 = vadd.f32 1.0, %v3853_v21 }
 0x21f   : > { %3856 = vrcp.f32 %v2492_v23 }
 0x229   : > { %v3855_v25 = vpop.eup %3854 }
 0x22a   : > { %v2495_v28 = vmul.f32 %v3855_v25, %v2461_v32 }
 0x22c   : > { %v3857_v26 = vpop.eup %3856  ;;  %v2506_v31 = vmul.f32 %v2504_v30, %v2495_v28 }
 0x22d   : > { %v2496_v29 = vmul.f32 %v3857_v26, %v2465_v6 }
 0x22f   : > { %v2507_v33 = vmul.f32 %v2504_v30, %v2496_v29 }
 0x2cd   : > { %v3346_v24 = vpop.f32.mrf.mxu1 }
 0x2ce   : > { %2741 = vrot.lane.b32.xlu0 %v3346_v24, %s3969_s14  ;;  %2702 = vrot.lane.b32.xlu1 %v3346_v24, %s3970_s15  ;;  %v2665_v35 = vsel %vm2663_vm3, %v3346_v24, -1e+30 }
 0x2cf   : > { %v2652_v27 = vpop.f32.mrf.mxu1  ;;  %v2670_v36 = vsel %vm2666_vm4, %v2665_v35, -inf }
 0x2d0   : > { %v2664_v38 = vsel %vm2663_vm3, %v2652_v27, -1e+30 }
 0x2d1   : > { %v2667_v39 = vsel %vm2666_vm4, %v2664_v38, -inf }
 0x2d2   : > { %2739 = vrot.lane.b32.xlu1 %v2652_v27, %s3969_s14  ;;  %2700 = vrot.lane.b32.xlu0 %v2652_v27, %s3970_s15 }
 0x2d6   : > { %2778 = vrot.lane.b32.xlu1 %v2652_v27, %s3971_s17  ;;  %2780 = vrot.lane.b32.xlu0 %v3346_v24, %s3971_s17 }
 0x2da   : > { %2512 = vrot.lane.b32.xlu0 %v2507_v33, %s3972_s18  ;;  %2510 = vrot.lane.b32.xlu1 %v2506_v31, %s3972_s18 }
 0x2f9   : > { %2671 = vmax.xlane.f32.xlu0 %v2670_v36 }
 0x2fe   : > { %2668 = vmax.xlane.f32.xlu1 %v2667_v39 }
 0x340   : > { %v2742_v55 = vpop.permute.xlu0 %2741  ;;  %v2703_v40 = vpop.permute.xlu1 %2702 }
 0x341   : > { %v2707_v41 = vsel %vm2697_vm5, %v2703_v40, -1e+30  ;;  %v2746_v43 = vsel %vm2738_vm6, %v2742_v55, -1e+30 }
 0x342   : > { %v2711_v42 = vsel %vm2666_vm4, %v2707_v41, -inf  ;;  %v2750_v47 = vsel %vm2666_vm4, %v2746_v43, -inf }
 0x343   : > { %2712 = vmax.xlane.f32.xlu1 %v2711_v42 }
 0x344   : > { %v2740_v7 = vpop.permute.xlu1 %2739  ;;  %v2701_v44 = vpop.permute.xlu0 %2700 }
 0x345   : > { %v2706_v45 = vsel %vm2697_vm5, %v2701_v44, -1e+30  ;;  %v2745_v48 = vsel %vm2738_vm6, %v2740_v7, -1e+30 }
 0x346   : > { %v2708_v46 = vsel %vm2666_vm4, %v2706_v45, -inf  ;;  %v2747_v52 = vsel %vm2666_vm4, %v2745_v48, -inf }
 0x347   : > { %2709 = vmax.xlane.f32.xlu0 %v2708_v46  ;;  %2751 = vmax.xlane.f32.xlu1 %v2750_v47 }
 0x348   : > { %v2779_v49 = vpop.permute.xlu1 %2778  ;;  %v2781_v50 = vpop.permute.xlu0 %2780 }
 0x349   : > { %v2785_v51 = vsel %vm2777_vm7, %v2781_v50, -1e+30  ;;  %v2784_v54 = vsel %vm2777_vm7, %v2779_v49, -1e+30 }
 0x34a   : > { %v2789_v53 = vsel %vm2666_vm4, %v2785_v51, -inf  ;;  %v2786_v58 = vsel %vm2666_vm4, %v2784_v54, -inf }
 0x34b   : > { %2748 = vmax.xlane.f32.xlu0 %v2747_v52  ;;  %2790 = vmax.xlane.f32.xlu1 %v2789_v53  ;;  %v2471_v52 = vmul.f32 0.1, %v4996_v10 }
 0x34c   : > { %v2513_v56 = vpop.permute.xlu0 %2512  ;;  %v2511_v59 = vpop.permute.xlu1 %2510 }
 0x34d   : > { %v2519_v57 = vsel %vm2078_vm0, %v2513_v56, 0.0  ;;  %v2516_v61 = vsel %vm2078_vm0, %v2511_v59, 0.0  ;;  %vm2902_vm0 = vcmask 801792  }
 0x34f   : > { %2787 = vmax.xlane.f32.xlu0 %v2786_v58  ;;  %2520 = vadd.xlane.f32.xlu1 %v2519_v57 }
 0x353   : > { %2517 = vadd.xlane.f32.xlu0 %v2516_v61 }
 0x382   : > { %v2672_v62 = vpop.xlane.xlu0 %2671 }
 0x383   : > { %v2674_v60 = vsub.f32 %v2665_v35, %v2672_v62 }
 0x385   : > { %v2677_v1 = vmul.f32 1.442695, %v2674_v60 }
 0x387   : > { %3858 = vpow2.f32 %v2677_v1  ;;  %v2669_v5 = vpop.xlane.xlu1 %2668 }
 0x388   : > { %v2673_v2 = vsub.f32 %v2664_v38, %v2669_v5 }
 0x38a   : > { %v2675_v32 = vmul.f32 1.442695, %v2673_v2 }
 0x38c   : > { %3860 = vpow2.f32 %v2675_v32 }
 0x394   : > { %v3859_v4 = vpop.eup %3858 }
 0x395   : > { %v5047_v37 = vsel %vm2663_vm3, %v3859_v4, 0.0 }
 0x396   : > { %v2684_v3 = vsel %vm2666_vm4, %v5047_v37, 0.0 }
 0x397   : > { %2685 = vadd.xlane.f32.xlu1 %v2684_v3 }
 0x399   : > { %v3861_v0 = vpop.eup %3860 }
 0x39a   : > { %v5053_v6 = vsel %vm2663_vm3, %v3861_v0, 0.0 }
 0x39b   : > { %v2681_v8 = vsel %vm2666_vm4, %v5053_v6, 0.0 }
 0x39c   : > { %2682 = vadd.xlane.f32.xlu0 %v2681_v8 }
 0x3cc   : > { %v2713_v11 = vpop.xlane.xlu1 %2712 }
 0x3cd   : > { %v2715_v14 = vsub.f32 %v2707_v41, %v2713_v11 }
 0x3cf   : > { %v2718_v16 = vmul.f32 1.442695, %v2715_v14 }
 0x3d0   : > { %v2710_v17 = vpop.xlane.xlu0 %2709  ;;  %v2752_v18 = vpop.xlane.xlu1 %2751 }
 0x3d1   : > { %3862 = vpow2.f32 %v2718_v16  ;;  %v2714_v19 = vsub.f32 %v2706_v45, %v2710_v17  ;;  %v2754_v20 = vsub.f32 %v2746_v43, %v2752_v18 }
 0x3d3   : > { %v2716_v21 = vmul.f32 1.442695, %v2714_v19  ;;  %v2757_v22 = vmul.f32 1.442695, %v2754_v20 }
 0x3d4   : > { %v2749_v23 = vpop.xlane.xlu0 %2748  ;;  %v2791_v24 = vpop.xlane.xlu1 %2790 }
 0x3d5   : > { %3864 = vpow2.f32 %v2716_v21  ;;  %v2753_v25 = vsub.f32 %v2745_v48, %v2749_v23  ;;  %v2793_v26 = vsub.f32 %v2785_v51, %v2791_v24  ;;  %v2472_v51 = vmul.f32 0.1, %v5002_v13 }
 0x3d6   : > { %3866 = vpow2.f32 %v2757_v22 }
 0x3d7   : > { %v2755_v27 = vmul.f32 1.442695, %v2753_v25  ;;  %v2796_v28 = vmul.f32 1.442695, %v2793_v26  ;;  %v2482_v26 = vld [vmem:[%s275_s9 + $0x8] sm:$0xff] }
 0x3d8   : > { %v2788_v29 = vpop.xlane.xlu0 %2787  ;;  %v2521_v53 = vpop.xlane.xlu1 %2520 }
 0x3d9   : > { %3868 = vpow2.f32 %v2755_v27  ;;  %v2792_v30 = vsub.f32 %v2784_v54, %v2788_v29  ;;  %v2523_v54 = vadd.f32 0.5, %v2521_v53  ;;  %v2481_v29 = vld [vmem:[%s275_s9] sm:$0xff]  ;;  %s3910_s9 = sshll.u32 %s3978_s29, 4  ;;  %s3911_s9 = int_to_ptr.vmem [resolvable:$false] %s3910_s9 }
 0x3da   : > { %3870 = vpow2.f32 %v2796_v28 }
 0x3db   : > { %v2794_v31 = vmul.f32 1.442695, %v2792_v30  ;;  %v2527_v58 = vand.u32 2147483647, %v2523_v54  ;;  %v2525_v21 = vmax.f32 %v2523_v54, 0.0 }
 0x3dc   : > { %v2518_v56 = vpop.xlane.xlu0 %2517 }
 0x3dd   : > { %3872 = vpow2.f32 %v2794_v31  ;;  %v2522_v57 = vadd.f32 0.5, %v2518_v56  ;;  %v2529_v61 = vsub.f32 0.0, %v2527_v58 }
 0x3de   : > { %v3863_v33 = vpop.eup %3862 }
 0x3df   : > { %v5059_v35 = vsel %vm2697_vm5, %v3863_v33, 0.0  ;;  %v2526_v59 = vand.u32 2147483647, %v2522_v57  ;;  %v2532_v60 = vmul.f32 1.442695, %v2529_v61  ;;  %v2524_v25 = vmax.f32 %v2522_v57, 0.0 }
 0x3e0   : > { %v2725_v36 = vsel %vm2666_vm4, %v5059_v35, 0.0 }
 0x3e1   : > { %2726 = vadd.xlane.f32.xlu1 %v2725_v36  ;;  %v2528_v62 = vsub.f32 0.0, %v2526_v59  ;;  %3874 = vpow2.f32 %v2532_v60 }
 0x3e2   : > { %v3865_v38 = vpop.eup %3864 }
 0x3e3   : > { %v3867_v39 = vpop.eup %3866  ;;  %v5065_v55 = vsel %vm2697_vm5, %v3865_v38, 0.0  ;;  %v2530_v1 = vmul.f32 1.442695, %v2528_v62 }
 0x3e4   : > { %v2722_v40 = vsel %vm2666_vm4, %v5065_v55, 0.0  ;;  %v5071_v41 = vsel %vm2738_vm6, %v3867_v39, 0.0 }
 0x3e5   : > { %2723 = vadd.xlane.f32.xlu0 %v2722_v40  ;;  %v2764_v42 = vsel %vm2666_vm4, %v5071_v41, 0.0  ;;  %3876 = vpow2.f32 %v2530_v1 }
 0x3e6   : > { %v3869_v43 = vpop.eup %3868  ;;  %2765 = vadd.xlane.f32.xlu1 %v2764_v42 }
 0x3e7   : > { %v3871_v7 = vpop.eup %3870  ;;  %v5077_v44 = vsel %vm2738_vm6, %v3869_v43, 0.0 }
 0x3e8   : > { %v2761_v45 = vsel %vm2666_vm4, %v5077_v44, 0.0  ;;  %v5083_v46 = vsel %vm2777_vm7, %v3871_v7, 0.0 }
 0x3e9   : > { %2762 = vadd.xlane.f32.xlu0 %v2761_v45  ;;  %v2803_v47 = vsel %vm2666_vm4, %v5083_v46, 0.0 }
 0x3ea   : > { %v3873_v48 = vpop.eup %3872  ;;  %2804 = vadd.xlane.f32.xlu1 %v2803_v47 }
 0x3eb   : > { %v5089_v49 = vsel %vm2777_vm7, %v3873_v48, 0.0 }
 0x3ec   : > { %v2800_v50 = vsel %vm2666_vm4, %v5089_v49, 0.0 }
 0x3ed   : > { %2801 = vadd.xlane.f32.xlu0 %v2800_v50 }
 0x3ee   : > { %v3875_v5 = vpop.eup %3874 }
 0x3ef   : > { %v2543_v2 = vadd.f32 1.0, %v3875_v5  ;;  %v2546_v10 = vmul.f32 -0.5, %v3875_v5  ;;  %v2549_v8 = vand.u32 2147483647, %v3875_v5 }
 0x3f1   : > { %3878 = vlog2.f32 %v2543_v2  ;;  %v2547_v0 = vadd.f32 1.0, %v2546_v10  ;;  %vm2550_vm8 = vcmp.lt.f32.partialorder %v2549_v8, 0.0004427343 }
 0x3f2   : > { %v3877_v13 = vpop.eup %3876 }
 0x3f3   : > { %v2534_v32 = vadd.f32 1.0, %v3877_v13  ;;  %v2537_v3 = vmul.f32 -0.5, %v3877_v13  ;;  %v2548_v17 = vmul.f32 %v3875_v5, %v2547_v0  ;;  %v2540_v18 = vand.u32 2147483647, %v3877_v13 }
 0x3f5   : > { %3880 = vlog2.f32 %v2534_v32  ;;  %v2538_v16 = vadd.f32 1.0, %v2537_v3  ;;  %vm2541_vm9 = vcmp.lt.f32.partialorder %v2540_v18, 0.0004427343 }
 0x3f6   : > { %3882 = vlog2.f32 %v2482_v26 }
 0x3f7   : > { %v2539_v22 = vmul.f32 %v3877_v13, %v2538_v16  ;;  %3884 = vlog2.f32 %v2481_v29 }
 0x3fb   : > { %2477 = vrot.lane.b32.xlu1 %v2472_v51, %s3973_s20 }
 0x3fe   : > { %v3879_v4 = vpop.eup %3878 }
 0x3ff   : > { %v2545_v14 = vmul.f32 0.6931472, %v3879_v4 }
 0x401   : > { %v2551_v20 = vsel %vm2550_vm8, %v2548_v17, %v2545_v14 }
 0x402   : > { %v3881_v11 = vpop.eup %3880  ;;  %v2553_v23 = vadd.f32 %v2551_v20, %v2525_v21 }
 0x403   : > { %2475 = vrot.lane.b32.xlu0 %v2471_v52, %s3973_s20  ;;  %v2536_v19 = vmul.f32 0.6931472, %v3881_v11  ;;  %v3883_v40 = vpop.eup %3882 }
 0x404   : > { %v2555_v28 = vadd.f32 0.1, %v2553_v23  ;;  %v3885_v7 = vpop.eup %3884  ;;  %v2561_v45 = vmul.f32 0.6931472, %v3883_v40 }
 0x405   : > { %v2542_v24 = vsel %vm2541_vm9, %v2539_v22, %v2536_v19  ;;  %v2559_v50 = vmul.f32 0.6931472, %v3885_v7 }
 0x406   : > { %v2552_v27 = vadd.f32 %v2542_v24, %v2524_v25  ;;  %v2557_v31 = vmax.f32 %v2555_v28, 1e-07  ;;  %v2563_v51 = vsub.f32 0.0, %v2561_v45 }
 0x407   : > { %v2562_v56 = vsub.f32 0.0, %v2559_v50 }
 0x408   : > { %v2554_v30 = vadd.f32 0.1, %v2552_v27  ;;  %3886 = vrcp.f32 %v2557_v31 }
 0x40a   : > { %v2556_v36 = vmax.f32 %v2554_v30, 1e-07 }
 0x40c   : > { %3888 = vrcp.f32 %v2556_v36 }
 0x415   : > { %v3887_v52 = vpop.eup %3886 }
 0x416   : > { %v2567_v59 = vmul.f32 %v3887_v52, %v2563_v51 }
 0x418   : > { %v2569_v5 = vmax.f32 %v2567_v59, 1e-07 }
 0x419   : > { %v3889_v57 = vpop.eup %3888 }
 0x41a   : > { %v2566_v1 = vmul.f32 %v3889_v57, %v2562_v56  ;;  %v2571_v4 = vmin.f32 %v2569_v5, 300.0 }
 0x41c   : > { %v2568_v10 = vmax.f32 %v2566_v1, 1e-07 }
 0x41e   : > { %v2570_v16 = vmin.f32 %v2568_v10, 300.0 }
 0x420   : > { %v2686_v33 = vpop.xlane.xlu1 %2685 }
 0x421   : > { %3890 = vrcp.f32 %v2686_v33 }
 0x425   : > { %v2683_v38 = vpop.xlane.xlu0 %2682 }
 0x426   : > { %3892 = vrcp.f32 %v2683_v38 }
 0x42e   : > { %v3891_v61 = vpop.eup %3890 }
 0x42f   : > { %v2690_v2 = vmul.f32 %v3891_v61, %v5047_v37 }
 0x431   : > { %v2692_v8 = vmul.f32 0.9, %v2690_v2 }
 0x433   : > { %v3893_v13 = vpop.eup %3892  ;;  %v2694_v19 = vadd.f32 0.02, %v2692_v8 }
 0x434   : > { %v2689_v3 = vmul.f32 %v3893_v13, %v5053_v6 }
 0x435   : > { %v2696_v25 = vsel %vm2663_vm3, %v2694_v19, 0.0 }
 0x436   : > { %v2691_v17 = vmul.f32 0.9, %v2689_v3 }
 0x438   : > { %v2693_v22 = vadd.f32 0.02, %v2691_v17 }
 0x46a   : > { %v2727_v39 = vpop.xlane.xlu1 %2726 }
 0x46b   : > { %3894 = vrcp.f32 %v2727_v39 }
 0x46e   : > { %v2724_v42 = vpop.xlane.xlu0 %2723 }
 0x46f   : > { %v2766_v43 = vpop.xlane.xlu1 %2765  ;;  %3896 = vrcp.f32 %v2724_v42 }
 0x470   : > { %3898 = vrcp.f32 %v2766_v43 }
 0x472   : > { %v2763_v47 = vpop.xlane.xlu0 %2762 }
 0x473   : > { %v2805_v48 = vpop.xlane.xlu1 %2804  ;;  %3900 = vrcp.f32 %v2763_v47 }
 0x474   : > { %3902 = vrcp.f32 %v2805_v48 }
 0x476   : > { %v2802_v53 = vpop.xlane.xlu0 %2801 }
 0x477   : > { %v2478_v54 = vpop.permute.xlu1 %2477  ;;  %3904 = vrcp.f32 %v2802_v53 }
 0x478   : > { %v2484_v58 = vadd.f32 %v2482_v26, %v2478_v54  ;;  %v3895_v32 = vpop.eup %3894 }
 0x479   : > { %v2731_v11 = vmul.f32 %v3895_v32, %v5059_v35 }
 0x47a   : > { %2820 = vrot.lane.b32.xlu0 %v2484_v58, %s3974_s28  ;;  %v2476_v62 = vpop.permute.xlu0 %2475 }
 0x47b   : > { %v2483_v60 = vadd.f32 %v2481_v29, %v2476_v62  ;;  %v2733_v20 = vmul.f32 0.9, %v2731_v11 }
 0x47c   : > { %v3897_v0 = vpop.eup %3896 }
 0x47d   : > { %2818 = vrot.lane.b32.xlu1 %v2483_v60, %s3974_s28  ;;  %v3899_v14 = vpop.eup %3898  ;;  %v2730_v37 = vmul.f32 %v3897_v0, %v5065_v55  ;;  %v2735_v55 = vadd.f32 0.01, %v2733_v20  ;;  %s3912_s28 = scalar_lea.vmem %s3911_s9, 512 }
 0x47e   : > { %2828 = vrot.lane.b32.xlu0 %v2478_v54, %s3968_s19  ;;  %v2770_v6 = vmul.f32 %v3899_v14, %v5071_v41  ;;  %v2695_v41 = vsel %vm2663_vm3, %v2693_v22, 0.0 }
 0x47f   : > { %v2732_v35 = vmul.f32 0.9, %v2730_v37 }
 0x480   : > { %v3901_v18 = vpop.eup %3900  ;;  %v2772_v26 = vmul.f32 0.9, %v2770_v6 }
 0x481   : > { %2826 = vrot.lane.b32.xlu1 %v2476_v62, %s3968_s19  ;;  %v3903_v21 = vpop.eup %3902  ;;  %v2769_v23 = vmul.f32 %v3901_v18, %v5077_v44  ;;  %v2737_v44 = vsel %vm2697_vm5, %v2735_v55, 0.0 }
 0x482   : > { %2836 = vrot.lane.b32.xlu0 %v2571_v4, %s3968_s19  ;;  %v2809_v27 = vmul.f32 %v3903_v21, %v5083_v46  ;;  %v2774_v30 = vadd.f32 0.014285714, %v2772_v26 }
 0x483   : > { %v2771_v28 = vmul.f32 0.9, %v2769_v23 }
 0x484   : > { %v3905_v24 = vpop.eup %3904  ;;  %v2811_v31 = vmul.f32 0.9, %v2809_v27  ;;  %v2776_v36 = vsel %vm2738_vm6, %v2774_v30, 0.0 }
 0x485   : > { %2834 = vrot.lane.b32.xlu1 %v2570_v16, %s3968_s19  ;;  %s3976_s19 = smov 78   ;;  %v2808_v29 = vmul.f32 %v3905_v24, %v5089_v49  ;;  %v2773_v46 = vadd.f32 0.014285714, %v2771_v28 }
 0x486   : > { %2842 = vrot.lane.b32.xlu0 %v4992_v9, %s3975_s10  ;;  %v2734_v9 = vadd.f32 0.01, %v2732_v35  ;;  %v2813_v38 = vadd.f32 0.025, %v2811_v31 }
 0x487   : > { %v2810_v33 = vmul.f32 0.9, %v2808_v29  ;;  %v2775_v49 = vsel %vm2738_vm6, %v2773_v46, 0.0 }
 0x488   : > { %v2815_v40 = vsel %vm2777_vm7, %v2813_v38, 0.0 }
 0x489   : > { %2840 = vrot.lane.b32.xlu1 %v4988_v63, %s3975_s10  ;;  %v2736_v63 = vsel %vm2697_vm5, %v2734_v9, 0.0  ;;  %v2812_v39 = vadd.f32 0.025, %v2810_v33 }
 0x48a   : > { %2850 = vrot.lane.b32.xlu0 %v2696_v25, %s3976_s19 }
 0x48b   : > { %v2814_v42 = vsel %vm2777_vm7, %v2812_v39, 0.0 }
 0x48d   : > { %2848 = vrot.lane.b32.xlu1 %v2695_v41, %s3976_s19 }
 0x48e   : > { %2858 = vrot.lane.b32.xlu0 %v2737_v44, %s3977_s11 }
 0x491   : > { %2856 = vrot.lane.b32.xlu1 %v2736_v63, %s3977_s11 }
 0x492   : > { %2866 = vrot.lane.b32.xlu0 %v2776_v36, %s3971_s17 }
 0x495   : > { %2864 = vrot.lane.b32.xlu1 %v2775_v49, %s3971_s17  ;;  %s3317_s17 = sshll.u32 %s4037_s25, 8  ;;  %s5164_s25 = scalar_lea.sflag [#allocation3], %s261_s12 }
 0x496   : > { %2874 = vrot.lane.b32.xlu0 %v2815_v40, %s3969_s14  ;;  %s5159_s16 = scalar_lea.hbm %s5210_s6, %s3317_s17 }
 0x499   : > { %2872 = vrot.lane.b32.xlu1 %v2814_v42, %s3969_s14  ;;  %s263_s14 = scalar_lea.vmem [#allocation2], %s3005_s13 }
 0x49a   : > { %s2927_s15 = sshll.u32 %s263_s14, 4  ;;  %s5153_s15 = int_to_ptr.vmem [resolvable:$true] %s2927_s15 }
 0x49b   : > { %s3906_s26 = scalar_lea.vmem %s5153_s15, 256  ;;  %p3913_p0 = scmp.lt.s32.totalorder %s5153_s15, %s3911_s9 }
 0x49c   : > { %p3907_p11 = scmp.ne.s32.totalorder %s5153_s15, %s3906_s26  ;;  %p3914_p1 = scmp.lt.s32.totalorder %s3912_s28, %s3906_s26 }
 0x49e   : > { %p3908_p12 = pnand %p3907_p11, %p4054_p5  ;;  %p3915_p2 = por %p3914_p1, %p3913_p0 }
 0x4a0   : > { %p3909_p13 = pneg %p3908_p12 }
 0x4a2   : > { %p3916_p3 = pnand %p3915_p2, %p3909_p13 }
 0x4ec   : > { %v2821_v43 = vpop.permute.xlu0 %2820 }
 0x4ed   : > { %v2886_v34 = vsel %vm2884_vm10, %v5006_v15, %v2821_v43 }
 0x4ef   : > { %v2819_v7 = vpop.permute.xlu1 %2818 }
 0x4f0   : > { %v2829_v45 = vpop.permute.xlu0 %2828  ;;  %v2885_v62 = vsel %vm2884_vm10, %v5000_v12, %v2819_v7 }
 0x4f1   : > { %v2889_v57 = vsel %vm2887_vm11, %v2886_v34, %v2829_v45 }
 0x4f3   : > { %v2827_v47 = vpop.permute.xlu1 %2826 }
 0x4f4   : > { %v2837_v48 = vpop.permute.xlu0 %2836  ;;  %v2888_v1 = vsel %vm2887_vm11, %v2885_v62, %v2827_v47 }
 0x4f5   : > { %v2892_v59 = vsel %vm2890_vm12, %v2889_v57, %v2837_v48 }
 0x4f7   : > { %v2835_v50 = vpop.permute.xlu1 %2834 }
 0x4f8   : > { %v2843_v51 = vpop.permute.xlu0 %2842  ;;  %v2891_v5 = vsel %vm2890_vm12, %v2888_v1, %v2835_v50 }
 0x4f9   : > { %v2895_v60 = vsel %vm2893_vm13, %v2892_v59, %v2843_v51 }
 0x4fb   : > { %v2841_v52 = vpop.permute.xlu1 %2840 }
 0x4fc   : > { %v2851_v53 = vpop.permute.xlu0 %2850  ;;  %v2894_v32 = vsel %vm2893_vm13, %v2891_v5, %v2841_v52 }
 0x4fd   : > { %v2898_v15 = vsel %vm2896_vm14, %v2895_v60, %v2851_v53 }
 0x4ff   : > { %v2849_v54 = vpop.permute.xlu1 %2848 }
 0x500   : > { %v2859_v56 = vpop.permute.xlu0 %2858  ;;  %v2897_v4 = vsel %vm2896_vm14, %v2894_v32, %v2849_v54 }
 0x501   : > { %v2901_v13 = vsel %vm2899_vm15, %v2898_v15, %v2859_v56 }
 0x503   : > { %v2857_v58 = vpop.permute.xlu1 %2856 }
 0x504   : > { %v2867_v61 = vpop.permute.xlu0 %2866  ;;  %v2900_v0 = vsel %vm2899_vm15, %v2897_v4, %v2857_v58 }
 0x505   : > { %v2904_v10 = vsel %vm2902_vm0, %v2901_v13, %v2867_v61 }
 0x507   : > { %v2865_v2 = vpop.permute.xlu1 %2864 }
 0x508   : > { %v2875_v12 = vpop.permute.xlu0 %2874  ;;  %v2903_v11 = vsel %vm2902_vm0, %v2900_v0, %v2865_v2 }
 0x509   : > { %v2907_v3 = vsel %vm2905_vm1, %v2904_v10, %v2875_v12 }
 0x50a   : > { %v2910_v8 = vsel %vm2908_vm2, %v2907_v3, 0.0 }
 0x50b   : > { %2912 = vst [vmem:[%s263_s14 + $0x8] sm:$0xff] %v2910_v8  ;;  %v2873_v14 = vpop.permute.xlu1 %2872 }
 0x50c   : > { %v2906_v16 = vsel %vm2905_vm1, %v2903_v11, %v2873_v14 }
 0x50d   : > { %v2909_v17 = vsel %vm2908_vm2, %v2906_v16, 0.0 }
 0x50e   : > { %2911 = vst [vmem:[%s263_s14] sm:$0xff] %v2909_v17 }
 0x50f   : > { %3919 = shalt.err (!%p3916_p3)
}
 0x510   : > { %s3920_s10 = scalar_lea.hbm %s5159_s16, 256  ;;  %s3924_s12 = scalar_lea.hbm %s5210_s6, 512 }
 0x511   : > { %p3921_p4 = scmp.ne.s32.totalorder %s5159_s16, %s3920_s10  ;;  %p3925_p9 = scmp.lt.s32.totalorder %s5159_s16, %s5210_s6 }
 0x512   : > { %p3926_p10 = scmp.lt.s32.totalorder %s3924_s12, %s3920_s10 }
 0x513   : > { %p3922_p7 = pnand %p3921_p4, %p4054_p5 }
 0x514   : > { %p3927_p11 = por %p3926_p10, %p3925_p9 }
 0x515   : > { %p3923_p8 = pneg %p3922_p7 }
 0x517   : > { %p3928_p12 = pnand %p3927_p11, %p3923_p8 }
 0x519   : > { %3931 = shalt.err (!%p3928_p12)
}
 0x51a   : > { %s3979_s17 = smov 128   ;;  %s3980_s18 = smov 8  }
 0x51b   : > { %3348 = dma.vmem_to_hbm [thread:$0]  (%p4054_p5), %s5153_s15, 256, %s5159_s16, %s5164_s25, %s3979_s17, %s3979_s17, %s3980_s18  }
 0x51c PF: > { %p3354_p13 = scmp.ge.s32.totalorder %s3966_s24, 2  ;;  %s2942_s20 = sand.u32 1, %s3954_s21  }
 0x51d   : > { %s2943_s26 = scalar_lea.sflag [#allocation3], %s2942_s20 }
 0x51e   : > { %p3351_p0 = pnand %p3354_p13, %p4058_p6 }
 0x520   : > { %p3352_p1 = pneg %p3351_p0 }
 0x522   : > { %3949 = dma.done.wait (%p3352_p1), %s2943_s26, 256  }
 0x523   : > { %3951 = vsyncadd (%p3352_p1), %s2943_s26, 4294967040  ;;  %p16_p2 = scmp.ge.s32.totalorder %s4041_s27, 4   ;;  %s5213_s21 = smov %s3958_s22 }
 0x524   : > { %s5214_s22 = smov %s3962_s23  ;;  %s5215_s23 = smov %s4052_s30 }
 0x525   : > { %s5216_s24 = smov %s4041_s27  ;;  %18 = sbr.rel (!%p16_p2) target bundleno = 3 (0x3), region = 82 }
 0x52a   :  { %2948 = vsyncpa [#allocation3], 1 }
 0x52b   :  { %2950 = vsyncpa [#allocation3 + $0x1], 1 }

</bundles_post_ra>
